<compile_context>
chip_gen: v6e
topology: v6e:2x2x1
jax: 0.10.0
libtpu: 0.0.40
codegen_flags: <defaults>
</compile_context>

<pallas_src>
import functools

import jax
import jax.numpy as jnp
from jax.experimental import pallas as pl
from jax.experimental.pallas import tpu as pltpu


def _round_up(x, m):
    return (x + m - 1) // m * m


# ----------------------------------------------------------------------------
# Kernel
# ----------------------------------------------------------------------------
def _coupling_kernel(n_layers, dout_p, xa_ref, xp_ref,
                     w_hid_ref, b_hid_ref, w_last_ref, b_last_ref, yp_ref):
    """Computes yp = xp * exp(s(xa)) + t(xa) with s/t fused into block matmuls.

    Shapes (per grid step):
      xa_ref    : (TB, P)                 conditioning half, zero-padded to P lanes
      xp_ref    : (TB, DOUT_P)            transformed half, zero-padded
      w_hid_ref : (layers-1, P, P)        layer 0 = [sW0 | tW0], rest block-diag
      b_hid_ref : (layers-1, 1, P)
      w_last_ref: (P, 2*DOUT_P)           -> [s_out_pad | t_out_pad]
      b_last_ref: (1, 2*DOUT_P)
      yp_ref    : (TB, DOUT_P)
    """
    h = xa_ref[...].astype(jnp.float32)                      # (TB, P)
    for i in range(n_layers - 1):                            # fused hidden layers
        h = jnp.tanh(
            jnp.dot(h, w_hid_ref[i], preferred_element_type=jnp.float32)
            + b_hid_ref[i])
    out = (jnp.dot(h, w_last_ref[...], preferred_element_type=jnp.float32)
           + b_last_ref[...])                                # (TB, 2*DOUT_P)
    s_out = out[:, :dout_p]                                  # lane-aligned split
    t_out = out[:, dout_p:]
    xp = xp_ref[...].astype(jnp.float32)
    # Padded lanes: xp=0, s=0 (exp(0)=1), t=0 -> output padding stays 0.
    yp_ref[...] = (xp * jnp.exp(s_out) + t_out).astype(yp_ref.dtype)


# ----------------------------------------------------------------------------
# Parameter construction (raw, matches the PyTorch FNN layout) and packing
# ----------------------------------------------------------------------------
def make_coupling_params(key, D, d, layers, width, mode, dtype=jnp.float32):
    """Deterministic Xavier-normal weights, zero biases. Weights are (fan_in, fan_out)."""
    din, dout = (d, D - d) if mode == "low" else (D - d, d)
    sizes = [din] + [width] * (layers - 1) + [dout]
    params = {}
    for name in ("s", "t"):
        ws, bs = [], []
        for i in range(layers):
            key, k1 = jax.random.split(key)
            fan_in, fan_out = sizes[i], sizes[i + 1]
            scale = jnp.sqrt(2.0 / (fan_in + fan_out)).astype(dtype)
            ws.append(scale * jax.random.normal(k1, (fan_in, fan_out), dtype))
            bs.append(jnp.zeros((1, fan_out), dtype))
        params[name] = (ws, bs)
    return params


def pack_coupling_params(params, din, dout, width, layers, dtype=jnp.float32):
    """Fuse s/t into padded block matrices (lane widths multiples of 128)."""
    assert layers >= 2, "packing assumes at least one hidden layer"
    P = _round_up(max(din, 2 * width), 128)
    DOUT_P = _round_up(dout, 128)

    s_ws, s_bs = params["s"]
    t_ws, t_bs = params["t"]

    w_hid = jnp.zeros((layers - 1, P, P), dtype)
    b_hid = jnp.zeros((layers - 1, 1, P), dtype)

    # Layer 0: shared input xa -> [hs | ht]  (horizontal concat of sW0, tW0).
    w_hid = w_hid.at[0, :din, :width].set(s_ws[0])
    w_hid = w_hid.at[0, :din, width:2 * width].set(t_ws[0])
    b_hid = b_hid.at[0, 0, :width].set(s_bs[0].reshape(-1))
    b_hid = b_hid.at[0, 0, width:2 * width].set(t_bs[0].reshape(-1))

    # Layers 1..L-2: block-diagonal so [hs|ht] stays independent.
    for i in range(1, layers - 1):
        w_hid = w_hid.at[i, :width, :width].set(s_ws[i])
        w_hid = w_hid.at[i, width:2 * width, width:2 * width].set(t_ws[i])
        b_hid = b_hid.at[i, 0, :width].set(s_bs[i].reshape(-1))
        b_hid = b_hid.at[i, 0, width:2 * width].set(t_bs[i].reshape(-1))

    # Last layer: [hs|ht] -> [s_out (padded to DOUT_P) | t_out (padded to DOUT_P)].
    w_last = jnp.zeros((P, 2 * DOUT_P), dtype)
    b_last = jnp.zeros((1, 2 * DOUT_P), dtype)
    w_last = w_last.at[:width, :dout].set(s_ws[-1])
    w_last = w_last.at[width:2 * width, DOUT_P:DOUT_P + dout].set(t_ws[-1])
    b_last = b_last.at[0, :dout].set(s_bs[-1].reshape(-1))
    b_last = b_last.at[0, DOUT_P:DOUT_P + dout].set(t_bs[-1].reshape(-1))

    return w_hid, b_hid, w_last, b_last, P, DOUT_P


# ----------------------------------------------------------------------------
# Wrapper
# ----------------------------------------------------------------------------
def coupling_layer_forward(x1x2, params, mode, layers, width, batch_tile=256):
    """Pallas implementation of CouplingLayer.forward."""
    x1, x2 = x1x2
    if mode == "up":
        xa, xp = x2, x1          # condition on x2, transform x1
    elif mode == "low":
        xa, xp = x1, x2          # condition on x1, transform x2
    else:
        raise ValueError(mode)

    B, din = xa.shape
    dout = xp.shape[1]
    w_hid, b_hid, w_last, b_last, P, DOUT_P = pack_coupling_params(
        params, din, dout, width, layers, dtype=jnp.float32)

    # Batch tile: multiple of 8 sublanes, up to `batch_tile` rows; pad batch.
    TB = min(batch_tile, _round_up(B, 8))
    Bp = _round_up(B, TB)

    xa_p = jnp.zeros((Bp, P), jnp.float32).at[:B, :din].set(xa.astype(jnp.float32))
    xp_p = jnp.zeros((Bp, DOUT_P), jnp.float32).at[:B, :dout].set(xp.astype(jnp.float32))

    kernel = functools.partial(_coupling_kernel, layers, DOUT_P)

    yp_p = pl.pallas_call(
        kernel,
        out_shape=jax.ShapeDtypeStruct((Bp, DOUT_P), jnp.float32),
        grid_spec=pltpu.PrefetchScalarGridSpec(
            num_scalar_prefetch=0,
            grid=(Bp // TB,),
            in_specs=[
                # Batch-streamed tiles.
                pl.BlockSpec((TB, P), lambda i: (i, 0)),
                pl.BlockSpec((TB, DOUT_P), lambda i: (i, 0)),
                # Packed weights: constant index_map -> DMA'd once, resident.
                pl.BlockSpec((layers - 1, P, P), lambda i: (0, 0, 0)),
                pl.BlockSpec((layers - 1, 1, P), lambda i: (0, 0, 0)),
                pl.BlockSpec((P, 2 * DOUT_P), lambda i: (0, 0)),
                pl.BlockSpec((1, 2 * DOUT_P), lambda i: (0, 0)),
            ],
            out_specs=pl.BlockSpec((TB, DOUT_P), lambda i: (i, 0)),
        ),
        compiler_params=pltpu.CompilerParams(
            dimension_semantics=("parallel",),       # shard batch tiles across TCs (v7x)
            vmem_limit_bytes=32 * 1024 * 1024,       # safe on v5e/v6e/v7x
        ),
    )(xa_p, xp_p, w_hid, b_hid, w_last, b_last)

    yp = yp_p[:B, :dout].astype(xp.dtype)
    if mode == "up":
        return (yp, x2)
    return (x1, yp)


# ----------------------------------------------------------------------------
# Pure-JAX reference (uses the raw, unfused parameters)
# ----------------------------------------------------------------------------
def _reference_forward(x1x2, params, mode):
    x1, x2 = x1x2

    def mlp(x, ws, bs):
        h = x
        for i in range(len(ws)):
            h = h @ ws[i] + bs[i]
            if i < len(ws) - 1:
                h = jnp.tanh(h)
        return h

    s_ws, s_bs = params["s"]
    t_ws, t_bs = params["t"]
    if mode == "up":
        return (x1 * jnp.exp(mlp(x2, s_ws, s_bs)) + mlp(x2, t_ws, t_bs), x2)
    return (x1, x2 * jnp.exp(mlp(x1, s_ws, s_bs)) + mlp(x1, t_ws, t_bs))


if __name__ == "__main__":
    # Module hyper-params (consistent with CouplingLayer.__init__)
    D, d = 8, 4
    layers, width = 3, 32
    batch = 512          # 2 batch tiles of 256 -> exercises the pipelined grid

    key = jax.random.PRNGKey(0)
    k1, k2, kparams = jax.random.split(key, 3)
    x1 = jax.random.normal(k1, (batch, d), jnp.float32)
    x2 = jax.random.normal(k2, (batch, D - d), jnp.float32)

    ok = True
    for mode in ("up", "low"):
        params = make_coupling_params(kparams, D, d, layers, width, mode)
        y1, y2 = coupling_layer_forward((x1, x2), params, mode, layers, width)
        y1 = jax.block_until_ready(y1)
        y2 = jax.block_until_ready(y2)

        r1, r2 = _reference_forward((x1, x2), params, mode)
        ok &= bool(jnp.allclose(y1, r1, atol=1e-4, rtol=1e-4))
        ok &= bool(jnp.allclose(y2, r2, atol=1e-4, rtol=1e-4))

    assert ok
    print("KERNEL_OK")
</pallas_src>

<mosaic_0001>
module attributes {stable_mosaic.version = 11 : i64} {
  func.func @_coupling_kernel(%arg0: i32, %arg1: memref<256x128xf32, #tpu.memory_space<vmem>>, %arg2: memref<256x128xf32, #tpu.memory_space<vmem>>, %arg3: memref<2x128x128xf32, #tpu.memory_space<vmem>>, %arg4: memref<2x1x128xf32, #tpu.memory_space<vmem>>, %arg5: memref<128x256xf32, #tpu.memory_space<vmem>>, %arg6: memref<1x256xf32, #tpu.memory_space<vmem>>, %arg7: memref<256x128xf32, #tpu.memory_space<vmem>>) attributes {dimension_semantics = [#tpu.dimension_semantics<parallel>], iteration_bounds = array<i64: 2>, scalar_prefetch = 0 : i64, scratch_operands = 0 : i64, tpu.core_type = #tpu.core_type<tc>, window_params = [{transform_indices = @transform_0, window_bounds = array<i64: 256, 128>}, {transform_indices = @transform_1, window_bounds = array<i64: 256, 128>}, {pipeline_mode = #tpu.pipeline_mode<synchronous>, transform_indices = @transform_2, window_bounds = array<i64: 2, 128, 128>}, {pipeline_mode = #tpu.pipeline_mode<synchronous>, transform_indices = @transform_3, window_bounds = array<i64: 2, 1, 128>}, {pipeline_mode = #tpu.pipeline_mode<synchronous>, transform_indices = @transform_4, window_bounds = array<i64: 128, 256>}, {pipeline_mode = #tpu.pipeline_mode<synchronous>, transform_indices = @transform_5, window_bounds = array<i64: 1, 256>}, {transform_indices = @transform_6, window_bounds = array<i64: 256, 128>}]} {
    %c0 = arith.constant 0 : index
    %c0_0 = arith.constant 0 : index
    %0 = vector.load %arg1[%c0, %c0_0] : memref<256x128xf32, #tpu.memory_space<vmem>>, vector<256x128xf32>
    %c0_1 = arith.constant 0 : index
    %c0_2 = arith.constant 0 : index
    %c0_3 = arith.constant 0 : index
    %1 = vector.load %arg3[%c0_1, %c0_2, %c0_3] : memref<2x128x128xf32, #tpu.memory_space<vmem>>, vector<1x128x128xf32>
    %2 = vector.shape_cast %1 : vector<1x128x128xf32> to vector<128x128xf32>
    %cst = arith.constant dense<0.000000e+00> : vector<256x128xf32>
    %3 = tpu.matmul %0, %2, %cst {dimension_numbers = #tpu.dot_dimension_numbers<[1], [0], [0], [1], [0, 0, 1, 1], [], []>} : vector<256x128xf32>, vector<128x128xf32>, vector<256x128xf32> -> vector<256x128xf32>
    %c0_4 = arith.constant 0 : index
    %c0_5 = arith.constant 0 : index
    %c0_6 = arith.constant 0 : index
    %4 = vector.load %arg4[%c0_4, %c0_5, %c0_6] : memref<2x1x128xf32, #tpu.memory_space<vmem>>, vector<1x1x128xf32>
    %5 = vector.shape_cast %4 : vector<1x1x128xf32> to vector<1x128xf32>
    %6 = vector.broadcast %5 : vector<1x128xf32> to vector<256x128xf32>
    %7 = arith.addf %3, %6 : vector<256x128xf32>
    %8 = math.tanh %7 : vector<256x128xf32>
    %c1 = arith.constant 1 : index
    %c0_7 = arith.constant 0 : index
    %c0_8 = arith.constant 0 : index
    %9 = vector.load %arg3[%c1, %c0_7, %c0_8] : memref<2x128x128xf32, #tpu.memory_space<vmem>>, vector<1x128x128xf32>
    %10 = vector.shape_cast %9 : vector<1x128x128xf32> to vector<128x128xf32>
    %cst_9 = arith.constant dense<0.000000e+00> : vector<256x128xf32>
    %11 = tpu.matmul %8, %10, %cst_9 {dimension_numbers = #tpu.dot_dimension_numbers<[1], [0], [0], [1], [0, 0, 1, 1], [], []>} : vector<256x128xf32>, vector<128x128xf32>, vector<256x128xf32> -> vector<256x128xf32>
    %c1_10 = arith.constant 1 : index
    %c0_11 = arith.constant 0 : index
    %c0_12 = arith.constant 0 : index
    %12 = vector.load %arg4[%c1_10, %c0_11, %c0_12] : memref<2x1x128xf32, #tpu.memory_space<vmem>>, vector<1x1x128xf32>
    %13 = vector.shape_cast %12 : vector<1x1x128xf32> to vector<1x128xf32>
    %14 = vector.broadcast %13 : vector<1x128xf32> to vector<256x128xf32>
    %15 = arith.addf %11, %14 : vector<256x128xf32>
    %16 = math.tanh %15 : vector<256x128xf32>
    %c0_13 = arith.constant 0 : index
    %c0_14 = arith.constant 0 : index
    %17 = vector.load %arg5[%c0_13, %c0_14] : memref<128x256xf32, #tpu.memory_space<vmem>>, vector<128x256xf32>
    %cst_15 = arith.constant dense<0.000000e+00> : vector<256x256xf32>
    %18 = tpu.matmul %16, %17, %cst_15 {dimension_numbers = #tpu.dot_dimension_numbers<[1], [0], [0], [1], [0, 0, 1, 1], [], []>} : vector<256x128xf32>, vector<128x256xf32>, vector<256x256xf32> -> vector<256x256xf32>
    %c0_16 = arith.constant 0 : index
    %c0_17 = arith.constant 0 : index
    %19 = vector.load %arg6[%c0_16, %c0_17] : memref<1x256xf32, #tpu.memory_space<vmem>>, vector<1x256xf32>
    %20 = vector.broadcast %19 : vector<1x256xf32> to vector<256x256xf32>
    %21 = arith.addf %18, %20 : vector<256x256xf32>
    %22 = vector.extract_strided_slice %21 {offsets = [0, 0], sizes = [256, 128], strides = [1, 1]} : vector<256x256xf32> to vector<256x128xf32>
    %23 = vector.extract_strided_slice %21 {offsets = [0, 128], sizes = [256, 128], strides = [1, 1]} : vector<256x256xf32> to vector<256x128xf32>
    %c0_18 = arith.constant 0 : index
    %c0_19 = arith.constant 0 : index
    %24 = vector.load %arg2[%c0_18, %c0_19] : memref<256x128xf32, #tpu.memory_space<vmem>>, vector<256x128xf32>
    %25 = math.exp %22 : vector<256x128xf32>
    %26 = arith.mulf %24, %25 : vector<256x128xf32>
    %27 = arith.addf %26, %23 : vector<256x128xf32>
    %c0_20 = arith.constant 0 : index
    %c0_21 = arith.constant 0 : index
    %28 = vector.load %arg7[%c0_20, %c0_21] : memref<256x128xf32, #tpu.memory_space<vmem>>, vector<256x128xf32>
    tpu.vector_store %arg7[%c0_20, %c0_21], %27 {strides = array<i32>} : memref<256x128xf32, #tpu.memory_space<vmem>>, vector<256x128xf32>,
    return
  }
  func.func @transform_0(%arg0: i32) -> (i32, i32) {
    %c0_i32 = arith.constant 0 : i32
    %c0_i32_0 = arith.constant 0 : i32
    return %arg0, %c0_i32 : i32, i32
  }
  func.func @transform_1(%arg0: i32) -> (i32, i32) {
    %c0_i32 = arith.constant 0 : i32
    %c0_i32_0 = arith.constant 0 : i32
    return %arg0, %c0_i32 : i32, i32
  }
  func.func @transform_2(%arg0: i32) -> (i32, i32, i32) {
    %c0_i32 = arith.constant 0 : i32
    %c0_i32_0 = arith.constant 0 : i32
    %c0_i32_1 = arith.constant 0 : i32
    %c0_i32_2 = arith.constant 0 : i32
    return %c0_i32, %c0_i32_0, %c0_i32_1 : i32, i32, i32
  }
  func.func @transform_3(%arg0: i32) -> (i32, i32, i32) {
    %c0_i32 = arith.constant 0 : i32
    %c0_i32_0 = arith.constant 0 : i32
    %c0_i32_1 = arith.constant 0 : i32
    %c0_i32_2 = arith.constant 0 : i32
    return %c0_i32, %c0_i32_0, %c0_i32_1 : i32, i32, i32
  }
  func.func @transform_4(%arg0: i32) -> (i32, i32) {
    %c0_i32 = arith.constant 0 : i32
    %c0_i32_0 = arith.constant 0 : i32
    %c0_i32_1 = arith.constant 0 : i32
    return %c0_i32, %c0_i32_0 : i32, i32
  }
  func.func @transform_5(%arg0: i32) -> (i32, i32) {
    %c0_i32 = arith.constant 0 : i32
    %c0_i32_0 = arith.constant 0 : i32
    %c0_i32_1 = arith.constant 0 : i32
    return %c0_i32, %c0_i32_0 : i32, i32
  }
  func.func @transform_6(%arg0: i32) -> (i32, i32) {
    %c0_i32 = arith.constant 0 : i32
    %c0_i32_0 = arith.constant 0 : i32
    return %arg0, %c0_i32 : i32, i32
  }
}

</mosaic_0001>

<bundles_post_ra>
// kernel: tpu_custom_call.1
= control target key start
LH: loop header
LB: loop body
LE: loop exit
PB: predicated region body
PF: predicated region fallthrough
CT: control target
= control target key end

     0   :  { %s2876_s0 = inlined_call_operand.hbm [shape: f32[512,128], index: 0, kind: input, shape index: {}]   ;;  %s2877_s1 = inlined_call_operand.hbm [shape: f32[512,128], index: 1, kind: input, shape index: {}]   ;;  %s2878_s2 = inlined_call_operand.hbm [shape: f32[2,128,128], index: 2, kind: input, shape index: {}]   ;;  %s2879_s3 = inlined_call_operand.vmem [shape: f32[2,1,128], index: 3, kind: input, shape index: {}]   ;;  %s2880_s4 = inlined_call_operand.hbm [shape: f32[128,256], index: 4, kind: input, shape index: {}]   ;;  %s2881_s5 = inlined_call_operand.vmem [shape: f32[1,256], index: 5, kind: input, shape index: {}]   ;;  %s2882_s6 = inlined_call_operand.hbm [shape: f32[512,128], index: 6, kind: output, shape index: {}]  }
   0x1   :  { %2890 = sst [smem:[#allocation16_spill]] %s2876_s0 }
   0x2   :  { %2891 = sst [smem:[#allocation17_spill]] %s2878_s2 }
   0x3   :  { %2892 = sst [smem:[#allocation18_spill]] %s2880_s4 }
   0x4   :  { %11 = vsyncpa [#allocation3], 0 }
   0x5   :  { %13 = vsyncpa [#allocation3 + $0x1], 0 }
   0x6   :  { %14 = vsyncpa [#allocation6], 0 }
   0x7   :  { %16 = vsyncpa [#allocation6 + $0x1], 0 }
   0x8   :  { %17 = vsyncpa [#allocation9], 0 }
   0x9   :  { %18 = vsyncpa [#allocation4], 0 }
   0xa   :  { %20 = vsyncpa [#allocation4 + $0x1], 0  ;;  %s2346_s21 = smov 0   ;;  %s2348_s22 = smov 0  }
   0xb   :  { %s2350_s23 = smov 0   ;;  %s2352_s24 = smov 0  }
   0xc LB: > { %s2367_s25 = sadd.s32 4294967295, %s2297_s24   ;;  %s1558_s26 = sadd.s32 4294967294, %s2297_s24   ;;  %s2297_s24 = sphi %s2352_s24, %s2915_s24   ;;  %s2293_s23 = sphi %s2350_s23, %s2914_s23   ;;  %s2289_s22 = sphi %s2348_s22, %s2913_s22   ;;  %s2285_s21 = sphi %s2346_s21, %s2912_s21  }
   0xd   : > { %p46_p0 = scmp.ne.s32.totalorder %s2289_s22, %s2285_s21  ;;  %p2887_p1 = scmp.eq.s32.totalorder %s2367_s25, 0 }
   0xe   : > { %p180_p2 = scmp.eq.s32.totalorder %s2367_s25, 1  ;;  %p186_p3 = scmp.eq.s32.totalorder %s1558_s26, 1 }
   0xf   : > { %p2376_p4 = por %p2887_p1, %p46_p0  ;;  %p1559_p5 = scmp.ge.s32.totalorder %s2297_s24, 1 }
  0x10   : > { %p2381_p6 = por %p186_p3, %p46_p0  ;;  %p193_p7 = scmp.lt.s32.totalorder %s2297_s24, 3 }
  0x11   : > { %s2893_s27 = scalar_select %p2376_p4, 1, 0 }
  0x12   : > { %s2894_s28 = scalar_select %p2381_p6, 1, 0 }
  0x13   : > { %p2386_p8 = pnand %p1559_p5, %p193_p7  ;;  %s2299_s30 = smov [#allocation7]  }
  0x14   : > { %s205_s7 = sshll.u32 %s2299_s30, 4  ;;  %s2300_s9 = smov [#allocation8]   ;;  %s206_s7 = int_to_ptr.vmem [resolvable:$true] %s205_s7 }
  0x15   : > { %p1856_p9 = pneg %p2386_p8  ;;  %s221_s10 = sshll.u32 %s2300_s9, 4  ;;  %s222_s10 = int_to_ptr.vmem [resolvable:$true] %s221_s10 }
  0x16   : > { %s2124_s11 = scalar_lea.vmem %s206_s7, 4096  ;;  %p2132_p5 = scmp.lt.s32.totalorder %s206_s7, %s206_s7 }
  0x17   : > { %p2395_p11 = pnand %p1856_p9, %p2887_p1  ;;  %p2125_p13 = scmp.ne.s32.totalorder %s206_s7, %s2124_s11 }
  0x18   : > { %p2133_p7 = scmp.lt.s32.totalorder %s2124_s11, %s2124_s11 }
  0x19   : > { %p2115_p12 = pneg %p2395_p11 }
  0x1a   : > { %p2134_p10 = por %p2133_p7, %p2132_p5 }
  0x1b   : > { %p2127_p0 = pnand %p2125_p13, %p2115_p12 }
  0x1d   : > { %p2128_p3 = pneg %p2127_p0 }
  0x1f   : > { %p2135_p9 = pnand %p2134_p10, %p2128_p3 }
  0x21   : > { %2138 = shalt.err (!%p2135_p9)
}
  0x22   : > { %s2883_s12 = smov 128   ;;  %s2885_s13 = smov 8  }
  0x23   : > { %s2897_s2 = sld [smem:[#allocation17_spill]]  ;;  %s2150_s16 = scalar_lea.vmem %s222_s10, 4096 }
  0x24   : > { %p2151_p13 = scmp.ne.s32.totalorder %s222_s10, %s2150_s16  ;;  %p2158_p10 = scmp.lt.s32.totalorder %s222_s10, %s222_s10 }
  0x25   : > { %p2159_p3 = scmp.lt.s32.totalorder %s2150_s16, %s2150_s16 }
  0x26   : > { %p2153_p0 = pnand %p2151_p13, %p2115_p12 }
  0x27   : > { %p2160_p7 = por %p2159_p3, %p2158_p10 }
  0x28   : > { %p2154_p5 = pneg %p2153_p0 }
  0x29   : > { %1859 = dma.hbm_to_vmem [thread:$0]  (!%p2395_p11), %s2897_s2, 4096, %s206_s7, [#allocation6], %s2883_s12, %s2883_s12, %s2885_s13  }
  0x2a   : > { %p2161_p9 = pnand %p2160_p7, %p2154_p5 }
  0x2c   : > { %2164 = shalt.err (!%p2161_p9)
}
  0x2d   : > { %s2303_s17 = smov 256   ;;  %s2304_s18 = smov 16  }
  0x2e   : > { %s2898_s4 = sld [smem:[#allocation18_spill]]  ;;  %s2421_s26 = sadd.s32 1, %s2297_s24  }
  0x2f   : > { %s30_s30 = ssub.s32 %s2297_s24, %s2421_s26  ;;  %s33_s7 = sadd.s32 1, %s2293_s23 }
  0x30   : > { %p31_p12 = scmp.eq.s32.totalorder %s30_s30, 0  ;;  %p40_p13 = scmp.ne.s32.totalorder %s2293_s23, %s2289_s22 }
  0x31   : > { %p41_p0 = scmp.eq.s32.totalorder %s2297_s24, 0  ;;  %p1876_p3 = scmp.lt.s32.totalorder %s2297_s24, 2 }
  0x32   : > { %s2430_s9 = scalar_select %p31_p12, %s2293_s23, %s33_s7  }
  0x33   : > { %p42_p5 = por %p41_p0, %p40_p13  ;;  %p2434_p10 = por %p180_p2, %p40_p13 }
  0x34   : > { %1862 = dma.hbm_to_vmem [thread:$0]  (!%p2395_p11), %s2898_s4, 4096, %s222_s10, [#allocation9], %s2303_s17, %s2303_s17, %s2304_s18  }
  0x35   : > { %s2899_s11 = scalar_select %p2434_p10, 1, 0 }
  0x36   : > { %s238_s8 = sand.u32 1, %s2293_s23   ;;  %s1583_s10 = sshll.u32 %s2297_s24, 12 }
  0x37   : > { %s1563_s14 = sshll.u32 %s238_s8, 8  ;;  %s2900_s0 = sld [smem:[#allocation16_spill]] }
  0x38   : > { %s242_s18 = scalar_lea.vmem [#allocation2], %s1563_s14  ;;  %p2448_p2 = pnand %p1876_p3, %p42_p5 }
  0x39   : > { %s249_s19 = sshll.u32 %s242_s18, 4  ;;  %s2455_s12 = scalar_lea.hbm %s2877_s1, %s1583_s10  ;;  %s2446_s19 = int_to_ptr.vmem [resolvable:$true] %s249_s19 }
  0x3a   : > { %s263_s15 = scalar_lea.vmem [#allocation5], %s1563_s14  ;;  %s2459_s13 = scalar_lea.sflag [#allocation3], %s238_s8 }
  0x3b   : > { %s2457_s16 = sshll.u32 %s263_s15, 4  ;;  %p2167_p7 = pneg %p2448_p2  ;;  %s2490_s16 = int_to_ptr.vmem [resolvable:$true] %s2457_s16 }
  0x3d   : > { %s2444_s17 = scalar_lea.hbm %s2900_s0, %s1583_s10  ;;  %s2170_s30 = scalar_lea.hbm %s2900_s0, 8192 }
  0x3e   : > { %s2165_s2 = scalar_lea.hbm %s2444_s17, 4096  ;;  %p2171_p13 = scmp.lt.s32.totalorder %s2444_s17, %s2900_s0 }
  0x3f   : > { %p2166_p11 = scmp.ne.s32.totalorder %s2444_s17, %s2165_s2  ;;  %p2172_p0 = scmp.lt.s32.totalorder %s2170_s30, %s2165_s2 }
  0x41   : > { %p2168_p9 = pnand %p2167_p7, %p2166_p11  ;;  %p2173_p5 = por %p2172_p0, %p2171_p13 }
  0x43   : > { %p2169_p12 = pneg %p2168_p9 }
  0x45   : > { %p2174_p3 = pnand %p2173_p5, %p2169_p12 }
  0x47   : > { %2177 = shalt.err (!%p2174_p3)
}
  0x48   : > { %s2178_s8 = scalar_lea.vmem %s2446_s19, 4096  ;;  %s2305_s4 = smov [#allocation2]  }
  0x49   : > { %p2179_p1 = scmp.ne.s32.totalorder %s2446_s19, %s2178_s8  ;;  %s2183_s14 = sshll.u32 %s2305_s4, 4  ;;  %s2184_s14 = int_to_ptr.vmem [resolvable:$false] %s2183_s14 }
  0x4a   : > { %s2185_s15 = scalar_lea.vmem %s2184_s14, 8192  ;;  %p2186_p6 = scmp.lt.s32.totalorder %s2446_s19, %s2184_s14 }
  0x4b   : > { %p2181_p11 = pnand %p2179_p1, %p2167_p7  ;;  %p2187_p10 = scmp.lt.s32.totalorder %s2185_s15, %s2178_s8 }
  0x4d   : > { %p2182_p9 = pneg %p2181_p11  ;;  %p2188_p4 = por %p2187_p10, %p2186_p6 }
  0x4f   : > { %p2189_p13 = pnand %p2188_p4, %p2182_p9 }
  0x51   : > { %2192 = shalt.err (!%p2189_p13)
}
  0x52   : > { %s2902_s2 = smov 8   ;;  %s2903_s18 = smov 128  }
  0x53   : > { %1866 = dma.hbm_to_vmem [thread:$0]  (!%p2448_p2), %s2444_s17, 4096, %s2446_s19, %s2459_s13, %s2903_s18, %s2903_s18, %s2902_s2  }
  0x54   : > { %s259_s30 = sand.u32 1, %s2297_s24   ;;  %s2193_s10 = scalar_lea.hbm %s2455_s12, 4096 }
  0x55   : > { %s260_s7 = scalar_lea.sflag [#allocation6], %s259_s30  ;;  %p2194_p1 = scmp.ne.s32.totalorder %s2455_s12, %s2193_s10 }
  0x56   : > { %s2198_s14 = scalar_lea.hbm %s2877_s1, 8192  ;;  %p2199_p10 = scmp.lt.s32.totalorder %s2455_s12, %s2877_s1 }
  0x57   : > { %p2196_p4 = pnand %p2194_p1, %p2167_p7  ;;  %p2200_p12 = scmp.lt.s32.totalorder %s2198_s14, %s2193_s10 }
  0x59   : > { %p2197_p6 = pneg %p2196_p4  ;;  %p2201_p0 = por %p2200_p12, %p2199_p10 }
  0x5b   : > { %p2202_p5 = pnand %p2201_p0, %p2197_p6 }
  0x5d   : > { %2205 = shalt.err (!%p2202_p5)
}
  0x5e   : > { %s2206_s13 = scalar_lea.vmem %s2490_s16, 4096  ;;  %s2306_s17 = smov [#allocation5]  }
  0x5f   : > { %p2207_p3 = scmp.ne.s32.totalorder %s2490_s16, %s2206_s13  ;;  %s2211_s19 = sshll.u32 %s2306_s17, 4  ;;  %s2212_s19 = int_to_ptr.vmem [resolvable:$false] %s2211_s19 }
  0x60   : > { %s2213_s30 = scalar_lea.vmem %s2212_s19, 8192  ;;  %p2214_p13 = scmp.lt.s32.totalorder %s2490_s16, %s2212_s19 }
  0x61   : > { %p2209_p11 = pnand %p2207_p3, %p2167_p7  ;;  %p2215_p1 = scmp.lt.s32.totalorder %s2213_s30, %s2206_s13 }
  0x63   : > { %p2210_p9 = pneg %p2209_p11  ;;  %p2216_p4 = por %p2215_p1, %p2214_p13 }
  0x65   : > { %p2217_p10 = pnand %p2216_p4, %p2210_p9 }
  0x67   : > { %2220 = shalt.err (!%p2217_p10)
}
  0x68   : > { %1869 = dma.hbm_to_vmem [thread:$0]  (!%p2448_p2), %s2455_s12, 4096, %s2490_s16, %s260_s7, %s2903_s18, %s2903_s18, %s2902_s2  }
  0x69   : > { %282 = sbr.rel (%p2386_p8) target bundleno = 930 (0x3a2), region = 44  ;;  %s2521_s0 = sand.u32 (!%p2386_p8), 1, %s2289_s22  }
  0x6a   : > { %s2524_s10 = sshll.u32 (!%p2386_p8), %s2521_s0, 8  ;;  %s285_s8 = scalar_lea.sflag (!%p2386_p8), [#allocation3], %s2521_s0 }
  0x6b   : > { %s2528_s20 = scalar_lea.vmem (!%p2386_p8), [#allocation2], %s2524_s10  ;;  %p2904_p7 = scmp.ne.s32.totalorder (!%p2386_p8), %s2893_s27, 0 }
  0x6e   : > { %2264 = dma.done.wait (%p2904_p7), %s285_s8, 4096  }
  0x6f   : > { %2266 = vsyncadd (%p2904_p7), %s285_s8, 4294963200  ;;  %s293_s29 = sand.u32 1, %s2367_s25   ;;  %s2536_s16 = scalar_lea.vmem [#allocation5], %s2524_s10 }
  0x70   : > { %s294_s12 = scalar_lea.sflag [#allocation6], %s293_s29 }
  0x71   : > { %2268 = dma.done.wait (%p2904_p7), %s294_s12, 4096  }
  0x72   : > { %2270 = vsyncadd (%p2904_p7), %s294_s12, 4294963200  ;;  %p2905_p8 = scmp.eq.s32.totalorder %s2367_s25, 0 }
  0x74   : > { %2272 = dma.done.wait (%p2905_p8), [#allocation6], 4096   ;;  %p2906_p2 = pmov %p2905_p8 }
  0x76   : > { %2274 = vsyncadd (%p2906_p2), [#allocation6], 4294963200  ;;  %p2907_p6 = pmov %p2906_p2 }
  0x77   : > { %p2908_p12 = pmov %p2906_p2 }
  0x78   : > { %2276 = dma.done.wait (%p2907_p6), [#allocation9], 4096  }
  0x79   : > { %2278 = vsyncadd (%p2908_p12), [#allocation9], 4294963200  ;;  %v389_v0 = vld [vmem:[#allocation7 + $0x78] sm:$0xff]  ;;  %v388_v1 = vld [vmem:[#allocation7 + $0x70] sm:$0xff]  ;;  %s2705_s15 = scalar_lea.vmem [#allocation10], %s2524_s10  ;;  %s1585_s13 = sshll.u32 %s2367_s25, 12 }
  0x7a   : > { %1682 = vmatprep.subr.mxu1 %v389_v0  ;;  %v387_v2 = vld [vmem:[#allocation7 + $0x68] sm:$0xff]  ;;  %v386_v3 = vld [vmem:[#allocation7 + $0x60] sm:$0xff]  ;;  %v385_v5 = vld [vmem:[#allocation7 + $0x58] sm:$0xff]  ;;  %s1443_s17 = sshll.u32 %s2705_s15, 4  ;;  %s2830_s10 = scalar_lea.hbm %s2882_s6, %s1585_s13  ;;  %s2832_s17 = int_to_ptr.vmem [resolvable:$true] %s1443_s17 }
  0x7b   : > { %1683 = vmatpush3.msra.mxu1 %v389_v0  ;;  %v342_v4 = vld [vmem:[%s2528_s20] sm:$0xff]  ;;  %v384_v6 = vld [vmem:[#allocation7 + $0x50] sm:$0xff]  ;;  %v383_v7 = vld [vmem:[#allocation7 + $0x48] sm:$0xff]  ;;  %s1430_s8 = scalar_lea.sflag [#allocation4], %s2521_s0  ;;  %s2221_s25 = scalar_lea.vmem %s2832_s17, 4096 }
  0x7c   : > { %1684 = vmatprep.subr.mxu1 %v388_v1  ;;  %1714 = vmatprep.mubr.f32.mxu1 %v342_v4  ;;  %v382_v8 = vld [vmem:[#allocation7 + $0x40] sm:$0xff]  ;;  %v381_v9 = vld [vmem:[#allocation7 + $0x38] sm:$0xff]  ;;  %v380_v10 = vld [vmem:[#allocation7 + $0x30] sm:$0xff]  ;;  %p2222_p0 = scmp.ne.s32.totalorder %s2832_s17, %s2221_s25  ;;  %p2909_p5 = scmp.ne.s32.totalorder %s2899_s11, 0 }
  0x7d   : > { %1685 = vmatpush3.msra.mxu1 %v388_v1  ;;  %v379_v11 = vld [vmem:[#allocation7 + $0x28] sm:$0xff]  ;;  %v378_v12 = vld [vmem:[#allocation7 + $0x20] sm:$0xff]  ;;  %v377_v13 = vld [vmem:[#allocation7 + $0x18] sm:$0xff] }
  0x7e   : > { %1686 = vmatprep.subr.mxu1 %v387_v2  ;;  %v376_v14 = vld [vmem:[#allocation7 + $0x10] sm:$0xff]  ;;  %v375_v15 = vld [vmem:[#allocation7 + $0x8] sm:$0xff]  ;;  %v374_v16 = vld [vmem:[#allocation7] sm:$0xff]  ;;  %p2223_p3 = pnand %p2222_p0, %p2909_p5 }
  0x7f   : > { %1687 = vmatpush3.msra.mxu1 %v387_v2  ;;  %v343_v17 = vld [vmem:[%s2528_s20 + $0x8] sm:$0xff]  ;;  %v670_v18 = vld [vmem:[#allocation7 + $0xf8] sm:$0xff]  ;;  %v344_v19 = vld [vmem:[%s2528_s20 + $0x10] sm:$0xff] }
  0x80   : > { %1688 = vmatprep.subr.mxu1 %v386_v3  ;;  %v669_v20 = vld [vmem:[#allocation7 + $0xf0] sm:$0xff]  ;;  %v345_v21 = vld [vmem:[%s2528_s20 + $0x18] sm:$0xff]  ;;  %v668_v22 = vld [vmem:[#allocation7 + $0xe8] sm:$0xff]  ;;  %p2224_p11 = pneg %p2223_p3 }
  0x81   : > { %1689 = vmatpush3.msra.mxu1 %v386_v3  ;;  %v346_v23 = vld [vmem:[%s2528_s20 + $0x20] sm:$0xff]  ;;  %v347_v25 = vld [vmem:[%s2528_s20 + $0x28] sm:$0xff]  ;;  %v666_v26 = vld [vmem:[#allocation7 + $0xd8] sm:$0xff] }
  0x82   : > { %1690 = vmatprep.subr.mxu1 %v385_v5  ;;  %v667_v24 = vld [vmem:[#allocation7 + $0xe0] sm:$0xff]  ;;  %v348_v27 = vld [vmem:[%s2528_s20 + $0x30] sm:$0xff]  ;;  %v349_v29 = vld [vmem:[%s2528_s20 + $0x38] sm:$0xff] }
  0x83   : > { %1691 = vmatpush3.msra.mxu1 %v385_v5  ;;  %v665_v28 = vld [vmem:[#allocation7 + $0xd0] sm:$0xff]  ;;  %v664_v30 = vld [vmem:[#allocation7 + $0xc8] sm:$0xff]  ;;  %v350_v31 = vld [vmem:[%s2528_s20 + $0x40] sm:$0xff] }
  0x84   : > { %1692 = vmatprep.subr.mxu1 %v384_v6  ;;  %v663_v32 = vld [vmem:[#allocation7 + $0xc0] sm:$0xff]  ;;  %v351_v33 = vld [vmem:[%s2528_s20 + $0x48] sm:$0xff]  ;;  %v662_v34 = vld [vmem:[#allocation7 + $0xb8] sm:$0xff] }
  0x85   : > { %1693 = vmatpush3.msra.mxu1 %v384_v6  ;;  %v352_v35 = vld [vmem:[%s2528_s20 + $0x50] sm:$0xff]  ;;  %v353_v37 = vld [vmem:[%s2528_s20 + $0x58] sm:$0xff]  ;;  %v660_v38 = vld [vmem:[#allocation7 + $0xa8] sm:$0xff] }
  0x86   : > { %1694 = vmatprep.subr.mxu1 %v383_v7  ;;  %v661_v36 = vld [vmem:[#allocation7 + $0xb0] sm:$0xff]  ;;  %v354_v39 = vld [vmem:[%s2528_s20 + $0x60] sm:$0xff]  ;;  %v355_v41 = vld [vmem:[%s2528_s20 + $0x68] sm:$0xff] }
  0x87   : > { %1695 = vmatpush3.msra.mxu1 %v383_v7  ;;  %v659_v40 = vld [vmem:[#allocation7 + $0xa0] sm:$0xff]  ;;  %v356_v42 = vld [vmem:[%s2528_s20 + $0x70] sm:$0xff]  ;;  %v357_v43 = vld [vmem:[%s2528_s20 + $0x78] sm:$0xff] }
  0x88   : > { %1696 = vmatprep.subr.mxu1 %v382_v8  ;;  %v358_v44 = vld [vmem:[%s2528_s20 + $0x80] sm:$0xff]  ;;  %v359_v45 = vld [vmem:[%s2528_s20 + $0x88] sm:$0xff]  ;;  %v360_v46 = vld [vmem:[%s2528_s20 + $0x90] sm:$0xff] }
  0x89   : > { %1697 = vmatpush3.msra.mxu1 %v382_v8  ;;  %v361_v47 = vld [vmem:[%s2528_s20 + $0x98] sm:$0xff]  ;;  %v362_v48 = vld [vmem:[%s2528_s20 + $0xa0] sm:$0xff]  ;;  %v363_v49 = vld [vmem:[%s2528_s20 + $0xa8] sm:$0xff] }
  0x8a   : > { %1698 = vmatprep.subr.mxu1 %v381_v9  ;;  %v364_v50 = vld [vmem:[%s2528_s20 + $0xb0] sm:$0xff]  ;;  %v365_v51 = vld [vmem:[%s2528_s20 + $0xb8] sm:$0xff]  ;;  %v366_v52 = vld [vmem:[%s2528_s20 + $0xc0] sm:$0xff] }
  0x8b   : > { %1699 = vmatpush3.msra.mxu1 %v381_v9  ;;  %v367_v53 = vld [vmem:[%s2528_s20 + $0xc8] sm:$0xff]  ;;  %v368_v54 = vld [vmem:[%s2528_s20 + $0xd0] sm:$0xff]  ;;  %v369_v55 = vld [vmem:[%s2528_s20 + $0xd8] sm:$0xff] }
  0x8c   : > { %1700 = vmatprep.subr.mxu1 %v380_v10  ;;  %v370_v56 = vld [vmem:[%s2528_s20 + $0xe0] sm:$0xff]  ;;  %v371_v57 = vld [vmem:[%s2528_s20 + $0xe8] sm:$0xff]  ;;  %v372_v58 = vld [vmem:[%s2528_s20 + $0xf0] sm:$0xff] }
  0x8d   : > { %1701 = vmatpush3.msra.mxu1 %v380_v10  ;;  %v373_v59 = vld [vmem:[%s2528_s20 + $0xf8] sm:$0xff]  ;;  %v657_v61 = vld [vmem:[#allocation7 + $0x90] sm:$0xff]  ;;  %v656_v62 = vld [vmem:[#allocation7 + $0x88] sm:$0xff]  ;;  %s2308_s20 = smov [#allocation10]  }
  0x8e   : > { %1702 = vmatprep.subr.mxu1 %v379_v11  ;;  %v658_v60 = vld [vmem:[#allocation7 + $0x98] sm:$0xff]  ;;  %v655_v63 = vld [vmem:[#allocation7 + $0x80] sm:$0xff]  ;;  %v966_v1 = vld [vmem:[#allocation8 + $0xf0] sm:$0xff]  ;;  %s2225_s29 = sshll.u32 %s2308_s20, 4  ;;  %s2226_s29 = int_to_ptr.vmem [resolvable:$false] %s2225_s29 }
  0x8f   : > { %1703 = vmatpush3.msra.mxu1 %v379_v11  ;;  %v967_v0 = vld [vmem:[#allocation8 + $0xf8] sm:$0xff]  ;;  %v965_v2 = vld [vmem:[#allocation8 + $0xe8] sm:$0xff]  ;;  %v964_v3 = vld [vmem:[#allocation8 + $0xe0] sm:$0xff]  ;;  %s2227_s12 = scalar_lea.vmem %s2226_s29, 8192  ;;  %p2228_p9 = scmp.lt.s32.totalorder %s2832_s17, %s2226_s29 }
  0x90   : > { %1704 = vmatprep.subr.mxu1 %v378_v12  ;;  %980 = vmatprep.subr.mxu0 %v967_v0  ;;  %v963_v4 = vld [vmem:[#allocation8 + $0xd8] sm:$0xff]  ;;  %v962_v5 = vld [vmem:[#allocation8 + $0xd0] sm:$0xff]  ;;  %v961_v6 = vld [vmem:[#allocation8 + $0xc8] sm:$0xff]  ;;  %p2229_p13 = scmp.lt.s32.totalorder %s2227_s12, %s2221_s25 }
  0x91   : > { %1705 = vmatpush3.msra.mxu1 %v378_v12  ;;  %981 = vmatpush1.msra.mxu0 %v966_v1  ;;  %v960_v7 = vld [vmem:[#allocation8 + $0xc0] sm:$0xff]  ;;  %v959_v8 = vld [vmem:[#allocation8 + $0xb8] sm:$0xff]  ;;  %v958_v9 = vld [vmem:[#allocation8 + $0xb0] sm:$0xff] }
  0x92   : > { %1706 = vmatprep.subr.mxu1 %v377_v13  ;;  %982 = vmatprep.subr.mxu0 %v965_v2  ;;  %v957_v10 = vld [vmem:[#allocation8 + $0xa8] sm:$0xff]  ;;  %v956_v11 = vld [vmem:[#allocation8 + $0xa0] sm:$0xff]  ;;  %v955_v12 = vld [vmem:[#allocation8 + $0x98] sm:$0xff]  ;;  %p2230_p1 = por %p2229_p13, %p2228_p9 }
  0x93   : > { %1707 = vmatpush3.msra.mxu1 %v377_v13  ;;  %983 = vmatpush1.msra.mxu0 %v964_v3  ;;  %v2585_v13 = vld [vmem:[%s2879_s3] ss:$0 sm:$0xff] }
  0x94   : > { %1708 = vmatprep.subr.mxu1 %v376_v14  ;;  %984 = vmatprep.subr.mxu0 %v963_v4  ;;  %p2231_p4 = pnand %p2230_p1, %p2224_p11 }
  0x95   : > { %1709 = vmatpush3.msra.mxu1 %v376_v14  ;;  %985 = vmatpush1.msra.mxu0 %v962_v5 }
  0x96   : > { %1710 = vmatprep.subr.mxu1 %v375_v15  ;;  %986 = vmatprep.subr.mxu0 %v961_v6 }
  0x97   : > { %1711 = vmatpush3.msra.mxu1 %v375_v15  ;;  %987 = vmatpush1.msra.mxu0 %v960_v7 }
  0x98   : > { %1712 = vmatprep.subr.mxu1 %v374_v16  ;;  %988 = vmatprep.subr.mxu0 %v959_v8 }
  0x99   : > { %1713 = vmatpush3.msra.mxu1 %v374_v16  ;;  %989 = vmatpush1.msra.mxu0 %v958_v9 }
  0x9a   : > { %1715 = vmatmul.mubr.f32.vlgmr.msra.gmra.mxu1 %v343_v17  ;;  %1762 = vmatprep.subr.mxu1 %v670_v18 }
  0x9b   : > { %1717 = vmatprep.mubr.f32.mxu1 %v344_v19  ;;  %1763 = vmatpush3.msra.mxu1 %v670_v18 }
  0x9c   : > { %1764 = vmatprep.subr.mxu1 %v669_v20  ;;  %990 = vmatprep.subr.mxu0 %v957_v10 }
  0x9d   : > { %1765 = vmatpush3.msra.mxu1 %v669_v20  ;;  %991 = vmatpush1.msra.mxu0 %v956_v11 }
  0x9e   : > { %1718 = vmatmul.mubr.f32.gmra.mxu1 %v345_v21  ;;  %1766 = vmatprep.subr.mxu1 %v668_v22 }
  0x9f   : > { %1720 = vmatprep.mubr.f32.mxu1 %v346_v23  ;;  %1767 = vmatpush3.msra.mxu1 %v668_v22 }
  0xa0   : > { %1768 = vmatprep.subr.mxu1 %v667_v24  ;;  %992 = vmatprep.subr.mxu0 %v955_v12 }
  0xa1   : > { %1769 = vmatpush3.msra.mxu1 %v667_v24 }
  0xa2   : > { %1721 = vmatmul.mubr.f32.gmra.mxu1 %v347_v25  ;;  %1770 = vmatprep.subr.mxu1 %v666_v26 }
  0xa3   : > { %1723 = vmatprep.mubr.f32.mxu1 %v348_v27  ;;  %1771 = vmatpush3.msra.mxu1 %v666_v26 }
  0xa4   : > { %1772 = vmatprep.subr.mxu1 %v665_v28 }
  0xa5   : > { %1773 = vmatpush3.msra.mxu1 %v665_v28 }
  0xa6   : > { %1724 = vmatmul.mubr.f32.gmra.mxu1 %v349_v29  ;;  %1774 = vmatprep.subr.mxu1 %v664_v30 }
  0xa7   : > { %1726 = vmatprep.mubr.f32.mxu1 %v350_v31  ;;  %1775 = vmatpush3.msra.mxu1 %v664_v30 }
  0xa8   : > { %1776 = vmatprep.subr.mxu1 %v663_v32 }
  0xa9   : > { %1777 = vmatpush3.msra.mxu1 %v663_v32 }
  0xaa   : > { %1727 = vmatmul.mubr.f32.gmra.mxu1 %v351_v33  ;;  %1778 = vmatprep.subr.mxu1 %v662_v34 }
  0xab   : > { %1729 = vmatprep.mubr.f32.mxu1 %v352_v35  ;;  %1779 = vmatpush3.msra.mxu1 %v662_v34 }
  0xac   : > { %1780 = vmatprep.subr.mxu1 %v661_v36 }
  0xad   : > { %1781 = vmatpush3.msra.mxu1 %v661_v36 }
  0xae   : > { %1730 = vmatmul.mubr.f32.gmra.mxu1 %v353_v37  ;;  %1782 = vmatprep.subr.mxu1 %v660_v38 }
  0xaf   : > { %1732 = vmatprep.mubr.f32.mxu1 %v354_v39  ;;  %1783 = vmatpush3.msra.mxu1 %v660_v38 }
  0xb0   : > { %1784 = vmatprep.subr.mxu1 %v659_v40 }
  0xb1   : > { %1785 = vmatpush3.msra.mxu1 %v659_v40 }
  0xb2   : > { %1733 = vmatmul.mubr.f32.gmra.mxu1 %v355_v41  ;;  %1786 = vmatprep.subr.mxu1 %v658_v60 }
  0xb3   : > { %1735 = vmatprep.mubr.f32.mxu1 %v356_v42  ;;  %1787 = vmatpush3.msra.mxu1 %v658_v60 }
  0xb4   : > { %1788 = vmatprep.subr.mxu1 %v657_v61 }
  0xb5   : > { %1789 = vmatpush3.msra.mxu1 %v657_v61 }
  0xb6   : > { %1736 = vmatmul.mubr.f32.gmra.mxu1 %v357_v43  ;;  %1790 = vmatprep.subr.mxu1 %v656_v62 }
  0xb7   : > { %1738 = vmatprep.mubr.f32.mxu1 %v358_v44  ;;  %1791 = vmatpush3.msra.mxu1 %v656_v62 }
  0xb8   : > { %1792 = vmatprep.subr.mxu1 %v655_v63 }
  0xb9   : > { %1793 = vmatpush3.msra.mxu1 %v655_v63 }
  0xba   : > { %1739 = vmatmul.mubr.f32.gmra.mxu1 %v359_v45 }
  0xbb   : > { %1741 = vmatprep.mubr.f32.mxu1 %v360_v46 }
  0xbe   : > { %1742 = vmatmul.mubr.f32.gmra.mxu1 %v361_v47 }
  0xbf   : > { %1744 = vmatprep.mubr.f32.mxu1 %v362_v48 }
  0xc2   : > { %1745 = vmatmul.mubr.f32.gmra.mxu1 %v363_v49 }
  0xc3   : > { %1747 = vmatprep.mubr.f32.mxu1 %v364_v50 }
  0xc6   : > { %1748 = vmatmul.mubr.f32.gmra.mxu1 %v365_v51 }
  0xc7   : > { %1750 = vmatprep.mubr.f32.mxu1 %v366_v52 }
  0xca   : > { %1751 = vmatmul.mubr.f32.gmra.mxu1 %v367_v53 }
  0xcb   : > { %1753 = vmatprep.mubr.f32.mxu1 %v368_v54 }
  0xce   : > { %1754 = vmatmul.mubr.f32.gmra.mxu1 %v369_v55 }
  0xcf   : > { %1756 = vmatprep.mubr.f32.mxu1 %v370_v56 }
  0xd2   : > { %1757 = vmatmul.mubr.f32.gmra.mxu1 %v371_v57 }
  0xd3   : > { %1759 = vmatprep.mubr.f32.mxu1 %v372_v58 }
  0xd6   : > { %1760 = vmatmul.mubr.f32.gmra.mxu1 %v373_v59 }
 0x15a   : > { %v1716_v14 = vpop.f32.mrf.mxu1 }
 0x15b   : > { %v469_v15 = vadd.f32 %v1716_v14, %v2585_v13 }
 0x15c   : > { %v463_v16 = vpop.f32.mrf.mxu1 }
 0x15d   : > { %v464_v17 = vadd.f32 %v2585_v13, %v463_v16 }
 0x15e   : > { %v1719_v18 = vpop.f32.mrf.mxu1 }
 0x15f   : > { %1921 = vtanh.f32 %v464_v17  ;;  %v479_v19 = vadd.f32 %v1719_v18, %v2585_v13 }
 0x160   : > { %1923 = vtanh.f32 %v469_v15  ;;  %v473_v20 = vpop.f32.mrf.mxu1 }
 0x161   : > { %v474_v21 = vadd.f32 %v2585_v13, %v473_v20  ;;  %1925 = vtanh.f32 %v479_v19 }
 0x162   : > { %v1722_v22 = vpop.f32.mrf.mxu1 }
 0x163   : > { %1927 = vtanh.f32 %v474_v21  ;;  %v489_v23 = vadd.f32 %v1722_v22, %v2585_v13 }
 0x164   : > { %v483_v24 = vpop.f32.mrf.mxu1 }
 0x165   : > { %v484_v25 = vadd.f32 %v2585_v13, %v483_v24  ;;  %1929 = vtanh.f32 %v489_v23 }
 0x166   : > { %v1725_v26 = vpop.f32.mrf.mxu1 }
 0x167   : > { %1931 = vtanh.f32 %v484_v25  ;;  %v499_v27 = vadd.f32 %v1725_v26, %v2585_v13 }
 0x168   : > { %v493_v28 = vpop.f32.mrf.mxu1 }
 0x169   : > { %v494_v29 = vadd.f32 %v2585_v13, %v493_v28  ;;  %1933 = vtanh.f32 %v499_v27 }
 0x16a   : > { %v1728_v30 = vpop.f32.mrf.mxu1 }
 0x16b   : > { %1935 = vtanh.f32 %v494_v29  ;;  %v509_v31 = vadd.f32 %v1728_v30, %v2585_v13 }
 0x16c   : > { %v1922_v32 = vpop.eup %1921  ;;  %v503_v33 = vpop.f32.mrf.mxu1 }
 0x16d   : > { %v1924_v34 = vpop.eup %1923  ;;  %1794 = vmatprep.mubr.f32.mxu1 %v1922_v32  ;;  %v504_v35 = vadd.f32 %v2585_v13, %v503_v33  ;;  %1937 = vtanh.f32 %v509_v31 }
 0x16e   : > { %1795 = vmatmul.mubr.f32.vlgmr.msra.gmra.mxu1 %v1924_v34  ;;  %v1731_v36 = vpop.f32.mrf.mxu1  ;;  %v1926_v37 = vpop.eup %1925 }
 0x16f   : > { %1939 = vtanh.f32 %v504_v35  ;;  %v519_v38 = vadd.f32 %v1731_v36, %v2585_v13 }
 0x170   : > { %v1928_v39 = vpop.eup %1927  ;;  %v513_v40 = vpop.f32.mrf.mxu1 }
 0x171   : > { %1797 = vmatprep.mubr.f32.mxu1 %v1928_v39  ;;  %v514_v41 = vadd.f32 %v2585_v13, %v513_v40  ;;  %1941 = vtanh.f32 %v519_v38 }
 0x172   : > { %1798 = vmatmul.mubr.f32.gmra.mxu1 %v1926_v37  ;;  %v1734_v42 = vpop.f32.mrf.mxu1  ;;  %v1930_v43 = vpop.eup %1929 }
 0x173   : > { %1943 = vtanh.f32 %v514_v41  ;;  %v529_v44 = vadd.f32 %v1734_v42, %v2585_v13 }
 0x174   : > { %v1932_v45 = vpop.eup %1931  ;;  %v523_v46 = vpop.f32.mrf.mxu1 }
 0x175   : > { %1800 = vmatprep.mubr.f32.mxu1 %v1932_v45  ;;  %v524_v47 = vadd.f32 %v2585_v13, %v523_v46  ;;  %1945 = vtanh.f32 %v529_v44 }
 0x176   : > { %1801 = vmatmul.mubr.f32.gmra.mxu1 %v1930_v43  ;;  %v1737_v48 = vpop.f32.mrf.mxu1  ;;  %v1934_v49 = vpop.eup %1933 }
 0x177   : > { %1947 = vtanh.f32 %v524_v47  ;;  %v539_v50 = vadd.f32 %v1737_v48, %v2585_v13  ;;  %v953_v47 = vld [vmem:[#allocation8 + $0x88] sm:$0xff]  ;;  %v952_v48 = vld [vmem:[#allocation8 + $0x80] sm:$0xff] }
 0x178   : > { %v1936_v51 = vpop.eup %1935  ;;  %v533_v52 = vpop.f32.mrf.mxu1 }
 0x179   : > { %1803 = vmatprep.mubr.f32.mxu1 %v1936_v51  ;;  %v534_v53 = vadd.f32 %v2585_v13, %v533_v52  ;;  %1949 = vtanh.f32 %v539_v50  ;;  %v950_v50 = vld [vmem:[#allocation8 + $0x70] sm:$0xff]  ;;  %v949_v51 = vld [vmem:[#allocation8 + $0x68] sm:$0xff]  ;;  %v948_v52 = vld [vmem:[#allocation8 + $0x60] sm:$0xff] }
 0x17a   : > { %1804 = vmatmul.mubr.f32.gmra.mxu1 %v1934_v49  ;;  %v1740_v54 = vpop.f32.mrf.mxu1  ;;  %v1938_v55 = vpop.eup %1937  ;;  %v951_v49 = vld [vmem:[#allocation8 + $0x78] sm:$0xff] }
 0x17b   : > { %1951 = vtanh.f32 %v534_v53  ;;  %v549_v56 = vadd.f32 %v1740_v54, %v2585_v13  ;;  %v947_v53 = vld [vmem:[#allocation8 + $0x58] sm:$0xff]  ;;  %v946_v54 = vld [vmem:[#allocation8 + $0x50] sm:$0xff] }
 0x17c   : > { %v1940_v57 = vpop.eup %1939  ;;  %v543_v58 = vpop.f32.mrf.mxu1 }
 0x17d   : > { %1806 = vmatprep.mubr.f32.mxu1 %v1940_v57  ;;  %v544_v59 = vadd.f32 %v2585_v13, %v543_v58  ;;  %1953 = vtanh.f32 %v549_v56  ;;  %v944_v56 = vld [vmem:[#allocation8 + $0x40] sm:$0xff]  ;;  %v943_v57 = vld [vmem:[#allocation8 + $0x38] sm:$0xff]  ;;  %v942_v58 = vld [vmem:[#allocation8 + $0x30] sm:$0xff] }
 0x17e   : > { %1807 = vmatmul.mubr.f32.gmra.mxu1 %v1938_v55  ;;  %v1743_v60 = vpop.f32.mrf.mxu1  ;;  %v1942_v61 = vpop.eup %1941  ;;  %v945_v55 = vld [vmem:[#allocation8 + $0x48] sm:$0xff] }
 0x17f   : > { %1955 = vtanh.f32 %v544_v59  ;;  %v559_v62 = vadd.f32 %v1743_v60, %v2585_v13  ;;  %v941_v59 = vld [vmem:[#allocation8 + $0x28] sm:$0xff]  ;;  %v940_v60 = vld [vmem:[#allocation8 + $0x20] sm:$0xff] }
 0x180   : > { %v1944_v63 = vpop.eup %1943  ;;  %v553_v0 = vpop.f32.mrf.mxu1 }
 0x181   : > { %1809 = vmatprep.mubr.f32.mxu1 %v1944_v63  ;;  %v554_v1 = vadd.f32 %v2585_v13, %v553_v0  ;;  %1957 = vtanh.f32 %v559_v62  ;;  %v938_v62 = vld [vmem:[#allocation8 + $0x10] sm:$0xff]  ;;  %v937_v63 = vld [vmem:[#allocation8 + $0x8] sm:$0xff]  ;;  %v2307_v0 = vmov 0.0  }
 0x182   : > { %1810 = vmatmul.mubr.f32.gmra.mxu1 %v1942_v61  ;;  %v1746_v2 = vpop.f32.mrf.mxu1  ;;  %v1946_v3 = vpop.eup %1945  ;;  %v939_v61 = vld [vmem:[#allocation8 + $0x18] sm:$0xff]  ;;  %1044 = vmatprep.mubr.f32.mxu0 %v2307_v0 }
 0x183   : > { %1959 = vtanh.f32 %v554_v1  ;;  %v569_v4 = vadd.f32 %v1746_v2, %v2585_v13  ;;  %v936_v1 = vld [vmem:[#allocation8] sm:$0xff] }
 0x184   : > { %v1948_v5 = vpop.eup %1947  ;;  %v563_v6 = vpop.f32.mrf.mxu1 }
 0x185   : > { %1812 = vmatprep.mubr.f32.mxu1 %v1948_v5  ;;  %v564_v7 = vadd.f32 %v2585_v13, %v563_v6  ;;  %1961 = vtanh.f32 %v569_v4 }
 0x186   : > { %1813 = vmatmul.mubr.f32.gmra.mxu1 %v1946_v3  ;;  %v1749_v8 = vpop.f32.mrf.mxu1  ;;  %v1950_v9 = vpop.eup %1949  ;;  %v2623_v3 = vld [vmem:[%s2879_s3 + $0x1] ss:$0 sm:$0xff] }
 0x187   : > { %1963 = vtanh.f32 %v564_v7  ;;  %v579_v10 = vadd.f32 %v1749_v8, %v2585_v13 }
 0x188   : > { %v1952_v11 = vpop.eup %1951  ;;  %v573_v12 = vpop.f32.mrf.mxu1 }
 0x189   : > { %1815 = vmatprep.mubr.f32.mxu1 %v1952_v11  ;;  %v574_v14 = vadd.f32 %v2585_v13, %v573_v12  ;;  %1965 = vtanh.f32 %v579_v10 }
 0x18a   : > { %1816 = vmatmul.mubr.f32.gmra.mxu1 %v1950_v9  ;;  %v1752_v15 = vpop.f32.mrf.mxu1  ;;  %v1954_v16 = vpop.eup %1953 }
 0x18b   : > { %1967 = vtanh.f32 %v574_v14  ;;  %v589_v17 = vadd.f32 %v1752_v15, %v2585_v13 }
 0x18c   : > { %v1956_v18 = vpop.eup %1955  ;;  %v583_v19 = vpop.f32.mrf.mxu1 }
 0x18d   : > { %1818 = vmatprep.mubr.f32.mxu1 %v1956_v18  ;;  %v584_v20 = vadd.f32 %v2585_v13, %v583_v19  ;;  %1969 = vtanh.f32 %v589_v17 }
 0x18e   : > { %1819 = vmatmul.mubr.f32.gmra.mxu1 %v1954_v16  ;;  %v1755_v21 = vpop.f32.mrf.mxu1  ;;  %v1958_v22 = vpop.eup %1957 }
 0x18f   : > { %1971 = vtanh.f32 %v584_v20  ;;  %v599_v23 = vadd.f32 %v1755_v21, %v2585_v13 }
 0x190   : > { %v1960_v24 = vpop.eup %1959  ;;  %v593_v25 = vpop.f32.mrf.mxu1 }
 0x191   : > { %1821 = vmatprep.mubr.f32.mxu1 %v1960_v24  ;;  %v594_v26 = vadd.f32 %v2585_v13, %v593_v25  ;;  %1973 = vtanh.f32 %v599_v23 }
 0x192   : > { %1822 = vmatmul.mubr.f32.gmra.mxu1 %v1958_v22  ;;  %v1758_v27 = vpop.f32.mrf.mxu1  ;;  %v1962_v28 = vpop.eup %1961 }
 0x193   : > { %1975 = vtanh.f32 %v594_v26  ;;  %v609_v29 = vadd.f32 %v1758_v27, %v2585_v13 }
 0x194   : > { %v1964_v30 = vpop.eup %1963  ;;  %v603_v31 = vpop.f32.mrf.mxu1 }
 0x195   : > { %1824 = vmatprep.mubr.f32.mxu1 %v1964_v30  ;;  %v604_v32 = vadd.f32 %v2585_v13, %v603_v31  ;;  %1977 = vtanh.f32 %v609_v29 }
 0x196   : > { %1825 = vmatmul.mubr.f32.gmra.mxu1 %v1962_v28  ;;  %v1761_v33 = vpop.f32.mrf.mxu1  ;;  %v1966_v34 = vpop.eup %1965 }
 0x197   : > { %1979 = vtanh.f32 %v604_v32  ;;  %v619_v35 = vadd.f32 %v1761_v33, %v2585_v13 }
 0x198   : > { %v1968_v36 = vpop.eup %1967  ;;  %v613_v37 = vpop.f32.mrf.mxu1 }
 0x199   : > { %1827 = vmatprep.mubr.f32.mxu1 %v1968_v36  ;;  %v614_v38 = vadd.f32 %v2585_v13, %v613_v37  ;;  %1981 = vtanh.f32 %v619_v35  ;;  %v954_v13 = vld [vmem:[#allocation8 + $0x90] sm:$0xff] }
 0x19a   : > { %1828 = vmatmul.mubr.f32.gmra.mxu1 %v1966_v34  ;;  %v1970_v39 = vpop.eup %1969  ;;  %993 = vmatpush1.msra.mxu0 %v954_v13 }
 0x19b   : > { %1983 = vtanh.f32 %v614_v38  ;;  %994 = vmatprep.subr.mxu0 %v953_v47 }
 0x19c   : > { %v1972_v40 = vpop.eup %1971  ;;  %995 = vmatpush1.msra.mxu0 %v952_v48 }
 0x19d   : > { %1830 = vmatprep.mubr.f32.mxu1 %v1972_v40  ;;  %996 = vmatprep.subr.mxu0 %v951_v49 }
 0x19e   : > { %1831 = vmatmul.mubr.f32.gmra.mxu1 %v1970_v39  ;;  %v1974_v41 = vpop.eup %1973  ;;  %997 = vmatpush1.msra.mxu0 %v950_v50 }
 0x19f   : > { %998 = vmatprep.subr.mxu0 %v949_v51 }
 0x1a0   : > { %v1976_v42 = vpop.eup %1975  ;;  %999 = vmatpush1.msra.mxu0 %v948_v52 }
 0x1a1   : > { %1833 = vmatprep.mubr.f32.mxu1 %v1976_v42  ;;  %1000 = vmatprep.subr.mxu0 %v947_v53 }
 0x1a2   : > { %1834 = vmatmul.mubr.f32.gmra.mxu1 %v1974_v41  ;;  %v1978_v43 = vpop.eup %1977  ;;  %1001 = vmatpush1.msra.mxu0 %v946_v54 }
 0x1a3   : > { %1002 = vmatprep.subr.mxu0 %v945_v55 }
 0x1a4   : > { %v1980_v44 = vpop.eup %1979  ;;  %1003 = vmatpush1.msra.mxu0 %v944_v56 }
 0x1a5   : > { %1836 = vmatprep.mubr.f32.mxu1 %v1980_v44  ;;  %1004 = vmatprep.subr.mxu0 %v943_v57 }
 0x1a6   : > { %1837 = vmatmul.mubr.f32.gmra.mxu1 %v1978_v43  ;;  %v1982_v45 = vpop.eup %1981  ;;  %1005 = vmatpush1.msra.mxu0 %v942_v58 }
 0x1a7   : > { %1006 = vmatprep.subr.mxu0 %v941_v59 }
 0x1a8   : > { %v1984_v46 = vpop.eup %1983  ;;  %1007 = vmatpush1.msra.mxu0 %v940_v60 }
 0x1a9   : > { %1839 = vmatprep.mubr.f32.mxu1 %v1984_v46  ;;  %1008 = vmatprep.subr.mxu0 %v939_v61 }
 0x1aa   : > { %1840 = vmatmul.mubr.f32.gmra.mxu1 %v1982_v45  ;;  %1009 = vmatpush1.msra.mxu0 %v938_v62 }
 0x1ab   : > { %1010 = vmatprep.subr.mxu0 %v937_v63 }
 0x1ac   : > { %1011 = vmatpush1.msra.mxu0 %v936_v1 }
 0x22e   : > { %v1796_v2 = vpop.f32.mrf.mxu1 }
 0x22f   : > { %v751_v7 = vadd.f32 %v1796_v2, %v2623_v3 }
 0x230   : > { %v745_v4 = vpop.f32.mrf.mxu1 }
 0x231   : > { %v746_v5 = vadd.f32 %v2623_v3, %v745_v4 }
 0x232   : > { %v1799_v6 = vpop.f32.mrf.mxu1 }
 0x233   : > { %1985 = vtanh.f32 %v746_v5  ;;  %v761_v11 = vadd.f32 %v1799_v6, %v2623_v3 }
 0x234   : > { %v755_v8 = vpop.f32.mrf.mxu1  ;;  %1987 = vtanh.f32 %v751_v7 }
 0x235   : > { %v756_v9 = vadd.f32 %v2623_v3, %v755_v8 }
 0x236   : > { %v1802_v10 = vpop.f32.mrf.mxu1 }
 0x237   : > { %1989 = vtanh.f32 %v756_v9  ;;  %v771_v17 = vadd.f32 %v1802_v10, %v2623_v3 }
 0x238   : > { %v765_v12 = vpop.f32.mrf.mxu1  ;;  %1991 = vtanh.f32 %v761_v11 }
 0x239   : > { %v766_v14 = vadd.f32 %v2623_v3, %v765_v12 }
 0x23a   : > { %v1805_v16 = vpop.f32.mrf.mxu1 }
 0x23b   : > { %1993 = vtanh.f32 %v766_v14  ;;  %v781_v23 = vadd.f32 %v1805_v16, %v2623_v3 }
 0x23c   : > { %v775_v19 = vpop.f32.mrf.mxu1  ;;  %1995 = vtanh.f32 %v771_v17 }
 0x23d   : > { %v776_v20 = vadd.f32 %v2623_v3, %v775_v19 }
 0x23e   : > { %v1808_v22 = vpop.f32.mrf.mxu1 }
 0x23f   : > { %1997 = vtanh.f32 %v776_v20  ;;  %v791_v29 = vadd.f32 %v1808_v22, %v2623_v3 }
 0x240   : > { %v1986_v15 = vpop.eup %1985  ;;  %v785_v25 = vpop.f32.mrf.mxu1  ;;  %1999 = vtanh.f32 %v781_v23 }
 0x241   : > { %1045 = vmatmul.mubr.f32.vlgmr.msra.gmra.mxu0 %v1986_v15  ;;  %v1988_v18 = vpop.eup %1987  ;;  %v786_v26 = vadd.f32 %v2623_v3, %v785_v25 }
 0x242   : > { %1050 = vmatprep.mubr.f32.mxu0 %v2307_v0  ;;  %v1811_v28 = vpop.f32.mrf.mxu1 }
 0x243   : > { %2001 = vtanh.f32 %v786_v26  ;;  %v801_v35 = vadd.f32 %v1811_v28, %v2623_v3 }
 0x244   : > { %v1990_v21 = vpop.eup %1989  ;;  %v795_v31 = vpop.f32.mrf.mxu1  ;;  %2003 = vtanh.f32 %v791_v29 }
 0x245   : > { %1051 = vmatmul.mubr.f32.gmra.mxu0 %v1988_v18  ;;  %v1992_v24 = vpop.eup %1991  ;;  %v796_v32 = vadd.f32 %v2623_v3, %v795_v31 }
 0x246   : > { %1056 = vmatprep.mubr.f32.mxu0 %v2307_v0  ;;  %v1814_v34 = vpop.f32.mrf.mxu1 }
 0x247   : > { %2005 = vtanh.f32 %v796_v32  ;;  %v811_v41 = vadd.f32 %v1814_v34, %v2623_v3 }
 0x248   : > { %v1994_v27 = vpop.eup %1993  ;;  %v805_v37 = vpop.f32.mrf.mxu1  ;;  %2007 = vtanh.f32 %v801_v35 }
 0x249   : > { %1057 = vmatmul.mubr.f32.gmra.mxu0 %v1990_v21  ;;  %v1996_v30 = vpop.eup %1995  ;;  %v806_v38 = vadd.f32 %v2623_v3, %v805_v37 }
 0x24a   : > { %1062 = vmatprep.mubr.f32.mxu0 %v2307_v0  ;;  %v1817_v40 = vpop.f32.mrf.mxu1 }
 0x24b   : > { %2009 = vtanh.f32 %v806_v38  ;;  %v821_v13 = vadd.f32 %v1817_v40, %v2623_v3  ;;  %v968_v40 = vld [vmem:[%s2881_s5] sm:$0x3] }
 0x24c   : > { %v1998_v33 = vpop.eup %1997  ;;  %v815_v43 = vpop.f32.mrf.mxu1  ;;  %2011 = vtanh.f32 %v811_v41 }
 0x24d   : > { %1063 = vmatmul.mubr.f32.gmra.mxu0 %v1992_v24  ;;  %v2000_v36 = vpop.eup %1999  ;;  %v816_v44 = vadd.f32 %v2623_v3, %v815_v43 }
 0x24e   : > { %1068 = vmatprep.mubr.f32.mxu0 %v2307_v0  ;;  %v1820_v46 = vpop.f32.mrf.mxu1 }
 0x24f   : > { %2013 = vtanh.f32 %v816_v44  ;;  %v831_v52 = vadd.f32 %v1820_v46, %v2623_v3 }
 0x250   : > { %v2002_v39 = vpop.eup %2001  ;;  %v825_v48 = vpop.f32.mrf.mxu1  ;;  %2015 = vtanh.f32 %v821_v13 }
 0x251   : > { %1069 = vmatmul.mubr.f32.gmra.mxu0 %v1994_v27  ;;  %v2004_v42 = vpop.eup %2003  ;;  %v826_v49 = vadd.f32 %v2623_v3, %v825_v48 }
 0x252   : > { %1074 = vmatprep.mubr.f32.mxu0 %v2307_v0  ;;  %v1823_v51 = vpop.f32.mrf.mxu1 }
 0x253   : > { %2017 = vtanh.f32 %v826_v49  ;;  %v841_v58 = vadd.f32 %v1823_v51, %v2623_v3 }
 0x254   : > { %v2006_v45 = vpop.eup %2005  ;;  %v835_v54 = vpop.f32.mrf.mxu1  ;;  %2019 = vtanh.f32 %v831_v52 }
 0x255   : > { %1075 = vmatmul.mubr.f32.gmra.mxu0 %v1996_v30  ;;  %v2008_v47 = vpop.eup %2007  ;;  %v836_v55 = vadd.f32 %v2623_v3, %v835_v54 }
 0x256   : > { %1080 = vmatprep.mubr.f32.mxu0 %v2307_v0  ;;  %v1826_v57 = vpop.f32.mrf.mxu1 }
 0x257   : > { %2021 = vtanh.f32 %v836_v55  ;;  %v851_v1 = vadd.f32 %v1826_v57, %v2623_v3 }
 0x258   : > { %v2010_v50 = vpop.eup %2009  ;;  %v845_v60 = vpop.f32.mrf.mxu1  ;;  %2023 = vtanh.f32 %v841_v58  ;;  %v1237_v58 = vld [vmem:[%s2536_s16] sm:$0xff] }
 0x259   : > { %1081 = vmatmul.mubr.f32.gmra.mxu0 %v1998_v33  ;;  %v2012_v53 = vpop.eup %2011  ;;  %v846_v61 = vadd.f32 %v2623_v3, %v845_v60 }
 0x25a   : > { %1086 = vmatprep.mubr.f32.mxu0 %v2307_v0  ;;  %v1829_v63 = vpop.f32.mrf.mxu1 }
 0x25b   : > { %2025 = vtanh.f32 %v846_v61  ;;  %v861_v8 = vadd.f32 %v1829_v63, %v2623_v3 }
 0x25c   : > { %v2014_v56 = vpop.eup %2013  ;;  %v855_v4 = vpop.f32.mrf.mxu1  ;;  %2027 = vtanh.f32 %v851_v1 }
 0x25d   : > { %1087 = vmatmul.mubr.f32.gmra.mxu0 %v2000_v36  ;;  %v2016_v59 = vpop.eup %2015  ;;  %v856_v5 = vadd.f32 %v2623_v3, %v855_v4  ;;  %v1238_v4 = vld [vmem:[%s2536_s16 + $0x8] sm:$0xff] }
 0x25e   : > { %1092 = vmatprep.mubr.f32.mxu0 %v2307_v0  ;;  %v1832_v7 = vpop.f32.mrf.mxu1 }
 0x25f   : > { %2029 = vtanh.f32 %v856_v5  ;;  %v871_v15 = vadd.f32 %v1832_v7, %v2623_v3 }
 0x260   : > { %v2018_v62 = vpop.eup %2017  ;;  %v865_v10 = vpop.f32.mrf.mxu1  ;;  %2031 = vtanh.f32 %v861_v8 }
 0x261   : > { %1093 = vmatmul.mubr.f32.gmra.mxu0 %v2002_v39  ;;  %v2020_v2 = vpop.eup %2019  ;;  %v866_v11 = vadd.f32 %v2623_v3, %v865_v10 }
 0x262   : > { %1098 = vmatprep.mubr.f32.mxu0 %v2307_v0  ;;  %v1835_v14 = vpop.f32.mrf.mxu1 }
 0x263   : > { %2033 = vtanh.f32 %v866_v11  ;;  %v881_v21 = vadd.f32 %v1835_v14, %v2623_v3  ;;  %v1239_v14 = vld [vmem:[%s2536_s16 + $0x10] sm:$0xff] }
 0x264   : > { %v2022_v6 = vpop.eup %2021  ;;  %v875_v17 = vpop.f32.mrf.mxu1  ;;  %2035 = vtanh.f32 %v871_v15 }
 0x265   : > { %1099 = vmatmul.mubr.f32.gmra.mxu0 %v2004_v42  ;;  %v2024_v9 = vpop.eup %2023  ;;  %v876_v18 = vadd.f32 %v2623_v3, %v875_v17 }
 0x266   : > { %1104 = vmatprep.mubr.f32.mxu0 %v2307_v0  ;;  %v1838_v20 = vpop.f32.mrf.mxu1 }
 0x267   : > { %2037 = vtanh.f32 %v876_v18  ;;  %v891_v27 = vadd.f32 %v1838_v20, %v2623_v3 }
 0x268   : > { %v2026_v12 = vpop.eup %2025  ;;  %v885_v23 = vpop.f32.mrf.mxu1  ;;  %2039 = vtanh.f32 %v881_v21 }
 0x269   : > { %1105 = vmatmul.mubr.f32.gmra.mxu0 %v2006_v45  ;;  %v2028_v16 = vpop.eup %2027  ;;  %v886_v24 = vadd.f32 %v2623_v3, %v885_v23  ;;  %v1240_v23 = vld [vmem:[%s2536_s16 + $0x18] sm:$0xff] }
 0x26a   : > { %1110 = vmatprep.mubr.f32.mxu0 %v2307_v0  ;;  %v1841_v26 = vpop.f32.mrf.mxu1 }
 0x26b   : > { %2041 = vtanh.f32 %v886_v24  ;;  %v901_v32 = vadd.f32 %v1841_v26, %v2623_v3 }
 0x26c   : > { %v2030_v19 = vpop.eup %2029  ;;  %v895_v29 = vpop.f32.mrf.mxu1  ;;  %2043 = vtanh.f32 %v891_v27 }
 0x26d   : > { %1111 = vmatmul.mubr.f32.gmra.mxu0 %v2008_v47  ;;  %v2032_v22 = vpop.eup %2031  ;;  %v896_v30 = vadd.f32 %v2623_v3, %v895_v29  ;;  %v970_v3 = vlaneseq }
 0x26e   : > { %1116 = vmatprep.mubr.f32.mxu0 %v2307_v0 }
 0x26f   : > { %2045 = vtanh.f32 %v896_v30  ;;  %v971_v38 = vshrl.u32 %v970_v3, 7 }
 0x270   : > { %v2034_v25 = vpop.eup %2033  ;;  %2047 = vtanh.f32 %v901_v32  ;;  %v1241_v32 = vld [vmem:[%s2536_s16 + $0x20] sm:$0xff] }
 0x271   : > { %1117 = vmatmul.mubr.f32.gmra.mxu0 %v2010_v50  ;;  %v2036_v28 = vpop.eup %2035  ;;  %v972_v39 = vsub.s32 0, %v971_v38  ;;  %v976_v51 = vsub.s32 1, %v971_v38 }
 0x272   : > { %1122 = vmatprep.mubr.f32.mxu0 %v2307_v0 }
 0x273   : > { %v2691_v41 = vrot.slane %v968_v40, %v972_v39 }
 0x274   : > { %v2038_v31 = vpop.eup %2037 }
 0x275   : > { %1123 = vmatmul.mubr.f32.gmra.mxu0 %v2012_v53  ;;  %v2040_v33 = vpop.eup %2039 }
 0x276   : > { %1128 = vmatprep.mubr.f32.mxu0 %v2307_v0 }
 0x278   : > { %v2042_v34 = vpop.eup %2041 }
 0x279   : > { %1129 = vmatmul.mubr.f32.gmra.mxu0 %v2014_v56  ;;  %v2044_v35 = vpop.eup %2043  ;;  %v2697_v56 = vrot.slane %v968_v40, %v976_v51  ;;  %v1242_v40 = vld [vmem:[%s2536_s16 + $0x28] sm:$0xff] }
 0x27a   : > { %1134 = vmatprep.mubr.f32.mxu0 %v2307_v0 }
 0x27c   : > { %v2046_v36 = vpop.eup %2045 }
 0x27d   : > { %1135 = vmatmul.mubr.f32.gmra.mxu0 %v2016_v59  ;;  %v2048_v37 = vpop.eup %2047 }
 0x27e   : > { %1140 = vmatprep.mubr.f32.mxu0 %v2307_v0 }
 0x281   : > { %1141 = vmatmul.mubr.f32.gmra.mxu0 %v2018_v62 }
 0x282   : > { %1146 = vmatprep.mubr.f32.mxu0 %v2307_v0 }
 0x285   : > { %1147 = vmatmul.mubr.f32.gmra.mxu0 %v2020_v2 }
 0x286   : > { %1152 = vmatprep.mubr.f32.mxu0 %v2307_v0 }
 0x289   : > { %1153 = vmatmul.mubr.f32.gmra.mxu0 %v2022_v6 }
 0x28a   : > { %1158 = vmatprep.mubr.f32.mxu0 %v2307_v0 }
 0x28d   : > { %1159 = vmatmul.mubr.f32.gmra.mxu0 %v2024_v9 }
 0x28e   : > { %1164 = vmatprep.mubr.f32.mxu0 %v2307_v0 }
 0x291   : > { %1165 = vmatmul.mubr.f32.gmra.mxu0 %v2026_v12 }
 0x292   : > { %1170 = vmatprep.mubr.f32.mxu0 %v2307_v0 }
 0x295   : > { %1171 = vmatmul.mubr.f32.gmra.mxu0 %v2028_v16 }
 0x296   : > { %1176 = vmatprep.mubr.f32.mxu0 %v2307_v0 }
 0x299   : > { %1177 = vmatmul.mubr.f32.gmra.mxu0 %v2030_v19 }
 0x29a   : > { %1182 = vmatprep.mubr.f32.mxu0 %v2307_v0 }
 0x29d   : > { %1183 = vmatmul.mubr.f32.gmra.mxu0 %v2032_v22 }
 0x29e   : > { %1188 = vmatprep.mubr.f32.mxu0 %v2307_v0 }
 0x2a1   : > { %1189 = vmatmul.mubr.f32.gmra.mxu0 %v2034_v25 }
 0x2a2   : > { %1194 = vmatprep.mubr.f32.mxu0 %v2307_v0 }
 0x2a5   : > { %1195 = vmatmul.mubr.f32.gmra.mxu0 %v2036_v28 }
 0x2a6   : > { %1200 = vmatprep.mubr.f32.mxu0 %v2307_v0 }
 0x2a9   : > { %1201 = vmatmul.mubr.f32.gmra.mxu0 %v2038_v31 }
 0x2aa   : > { %1206 = vmatprep.mubr.f32.mxu0 %v2307_v0 }
 0x2ad   : > { %1207 = vmatmul.mubr.f32.gmra.mxu0 %v2040_v33 }
 0x2ae   : > { %1212 = vmatprep.mubr.f32.mxu0 %v2307_v0 }
 0x2b1   : > { %1213 = vmatmul.mubr.f32.gmra.mxu0 %v2042_v34 }
 0x2b2   : > { %1218 = vmatprep.mubr.f32.mxu0 %v2307_v0 }
 0x2b5   : > { %1219 = vmatmul.mubr.f32.gmra.mxu0 %v2044_v35 }
 0x2b6   : > { %1224 = vmatprep.mubr.f32.mxu0 %v2307_v0 }
 0x2b9   : > { %1225 = vmatmul.mubr.f32.gmra.mxu0 %v2046_v36 }
 0x2ba   : > { %1230 = vmatprep.mubr.f32.mxu0 %v2307_v0 }
 0x2bd   : > { %1231 = vmatmul.mubr.f32.gmra.mxu0 %v2048_v37 }
 0x301   : > { %v1046_v42 = vpop.f32.mrf.mxu0 }
 0x302   : > { %v1047_v43 = vadd.f32 %v1046_v42, %v2691_v41 }
 0x303   : > { %v1048_v44 = vpop.f32.mrf.mxu0 }
 0x304   : > { %v1269_v45 = vmul.f32 1.442695, %v1047_v43  ;;  %v1049_v63 = vadd.f32 %v1048_v44, %v2697_v56 }
 0x305   : > { %v1052_v46 = vpop.f32.mrf.mxu0 }
 0x306   : > { %2049 = vpow2.f32 %v1269_v45  ;;  %v1053_v0 = vadd.f32 %v1052_v46, %v2691_v41 }
 0x307   : > { %v1054_v13 = vpop.f32.mrf.mxu0 }
 0x308   : > { %v1271_v47 = vmul.f32 1.442695, %v1053_v0  ;;  %v1055_v10 = vadd.f32 %v1054_v13, %v2697_v56 }
 0x309   : > { %v1058_v48 = vpop.f32.mrf.mxu0 }
 0x30a   : > { %2051 = vpow2.f32 %v1271_v47  ;;  %v1059_v49 = vadd.f32 %v1058_v48, %v2691_v41  ;;  %v1243_v48 = vld [vmem:[%s2536_s16 + $0x30] sm:$0xff] }
 0x30b   : > { %v1060_v50 = vpop.f32.mrf.mxu0 }
 0x30c   : > { %v1273_v52 = vmul.f32 1.442695, %v1059_v49  ;;  %v1061_v20 = vadd.f32 %v1060_v50, %v2697_v56 }
 0x30d   : > { %v1064_v53 = vpop.f32.mrf.mxu0 }
 0x30e   : > { %2053 = vpow2.f32 %v1273_v52  ;;  %v1065_v54 = vadd.f32 %v1064_v53, %v2691_v41 }
 0x30f   : > { %v1066_v55 = vpop.f32.mrf.mxu0 }
 0x310   : > { %v1275_v57 = vmul.f32 1.442695, %v1065_v54  ;;  %v1067_v29 = vadd.f32 %v1066_v55, %v2697_v56 }
 0x311   : > { %v1070_v59 = vpop.f32.mrf.mxu0 }
 0x312   : > { %2055 = vpow2.f32 %v1275_v57  ;;  %v1071_v60 = vadd.f32 %v1070_v59, %v2691_v41 }
 0x313   : > { %v2050_v61 = vpop.eup %2049  ;;  %v1072_v62 = vpop.f32.mrf.mxu0 }
 0x314   : > { %v1333_v1 = vmul.f32 %v2050_v61, %v1237_v58  ;;  %v1277_v2 = vmul.f32 1.442695, %v1071_v60  ;;  %v1073_v3 = vadd.f32 %v1072_v62, %v2697_v56  ;;  %v1244_v58 = vld [vmem:[%s2536_s16 + $0x38] sm:$0xff] }
 0x315   : > { %v1076_v5 = vpop.f32.mrf.mxu0 }
 0x316   : > { %v1365_v6 = vadd.f32 %v1333_v1, %v1049_v63  ;;  %2057 = vpow2.f32 %v1277_v2  ;;  %v1077_v7 = vadd.f32 %v1076_v5, %v2691_v41  ;;  %v1245_v5 = vld [vmem:[%s2536_s16 + $0x40] sm:$0xff] }
 0x317   : > { %v2052_v8 = vpop.eup %2051  ;;  %v1078_v9 = vpop.f32.mrf.mxu0 }
 0x318   : > { %1397 = vst [vmem:[%s2705_s15] sm:$0xff] %v1365_v6  ;;  %v1334_v11 = vmul.f32 %v2052_v8, %v1238_v4  ;;  %v1279_v12 = vmul.f32 1.442695, %v1077_v7  ;;  %v1079_v0 = vadd.f32 %v1078_v9, %v2697_v56 }
 0x319   : > { %v1082_v15 = vpop.f32.mrf.mxu0 }
 0x31a   : > { %v1366_v16 = vadd.f32 %v1334_v11, %v1055_v10  ;;  %2059 = vpow2.f32 %v1279_v12  ;;  %v1083_v17 = vadd.f32 %v1082_v15, %v2691_v41  ;;  %v1246_v15 = vld [vmem:[%s2536_s16 + $0x48] sm:$0xff] }
 0x31b   : > { %v2054_v18 = vpop.eup %2053  ;;  %v1084_v19 = vpop.f32.mrf.mxu0 }
 0x31c   : > { %1398 = vst [vmem:[%s2705_s15 + $0x8] sm:$0xff] %v1366_v16  ;;  %v1335_v21 = vmul.f32 %v2054_v18, %v1239_v14  ;;  %v1281_v22 = vmul.f32 1.442695, %v1083_v17  ;;  %v1085_v54 = vadd.f32 %v1084_v19, %v2697_v56 }
 0x31d   : > { %v1088_v24 = vpop.f32.mrf.mxu0 }
 0x31e   : > { %v1367_v25 = vadd.f32 %v1335_v21, %v1061_v20  ;;  %2061 = vpow2.f32 %v1281_v22  ;;  %v1089_v26 = vadd.f32 %v1088_v24, %v2691_v41  ;;  %v1247_v24 = vld [vmem:[%s2536_s16 + $0x50] sm:$0xff] }
 0x31f   : > { %v2056_v27 = vpop.eup %2055  ;;  %v1090_v28 = vpop.f32.mrf.mxu0 }
 0x320   : > { %1399 = vst [vmem:[%s2705_s15 + $0x10] sm:$0xff] %v1367_v25  ;;  %v1336_v30 = vmul.f32 %v2056_v27, %v1240_v23  ;;  %v1283_v31 = vmul.f32 1.442695, %v1089_v26  ;;  %v1091_v1 = vadd.f32 %v1090_v28, %v2697_v56 }
 0x321   : > { %v1094_v33 = vpop.f32.mrf.mxu0 }
 0x322   : > { %v1368_v34 = vadd.f32 %v1336_v30, %v1067_v29  ;;  %2063 = vpow2.f32 %v1283_v31  ;;  %v1095_v35 = vadd.f32 %v1094_v33, %v2691_v41  ;;  %v1248_v33 = vld [vmem:[%s2536_s16 + $0x58] sm:$0xff] }
 0x323   : > { %v2058_v36 = vpop.eup %2057  ;;  %v1096_v37 = vpop.f32.mrf.mxu0 }
 0x324   : > { %1400 = vst [vmem:[%s2705_s15 + $0x18] sm:$0xff] %v1368_v34  ;;  %v1337_v38 = vmul.f32 %v2058_v36, %v1241_v32  ;;  %v1285_v39 = vmul.f32 1.442695, %v1095_v35  ;;  %v1097_v11 = vadd.f32 %v1096_v37, %v2697_v56 }
 0x325   : > { %v1100_v42 = vpop.f32.mrf.mxu0 }
 0x326   : > { %v1369_v43 = vadd.f32 %v1337_v38, %v1073_v3  ;;  %2065 = vpow2.f32 %v1285_v39  ;;  %v1101_v44 = vadd.f32 %v1100_v42, %v2691_v41  ;;  %v1249_v42 = vld [vmem:[%s2536_s16 + $0x60] sm:$0xff] }
 0x327   : > { %v2060_v45 = vpop.eup %2059  ;;  %v1102_v46 = vpop.f32.mrf.mxu0 }
 0x328   : > { %1401 = vst [vmem:[%s2705_s15 + $0x20] sm:$0xff] %v1369_v43  ;;  %v1338_v13 = vmul.f32 %v2060_v45, %v1242_v40  ;;  %v1287_v47 = vmul.f32 1.442695, %v1101_v44  ;;  %v1103_v21 = vadd.f32 %v1102_v46, %v2697_v56 }
 0x329   : > { %v1106_v49 = vpop.f32.mrf.mxu0 }
 0x32a   : > { %v1370_v50 = vadd.f32 %v1338_v13, %v1079_v0  ;;  %2067 = vpow2.f32 %v1287_v47  ;;  %v1107_v51 = vadd.f32 %v1106_v49, %v2691_v41  ;;  %v1250_v49 = vld [vmem:[%s2536_s16 + $0x68] sm:$0xff] }
 0x32b   : > { %v2062_v52 = vpop.eup %2061  ;;  %v1108_v53 = vpop.f32.mrf.mxu0 }
 0x32c   : > { %1402 = vst [vmem:[%s2705_s15 + $0x28] sm:$0xff] %v1370_v50  ;;  %v1339_v55 = vmul.f32 %v2062_v52, %v1243_v48  ;;  %v1289_v57 = vmul.f32 1.442695, %v1107_v51  ;;  %v1109_v30 = vadd.f32 %v1108_v53, %v2697_v56 }
 0x32d   : > { %v1112_v59 = vpop.f32.mrf.mxu0 }
 0x32e   : > { %v1371_v60 = vadd.f32 %v1339_v55, %v1085_v54  ;;  %2069 = vpow2.f32 %v1289_v57  ;;  %v1113_v61 = vadd.f32 %v1112_v59, %v2691_v41  ;;  %v1251_v59 = vld [vmem:[%s2536_s16 + $0x70] sm:$0xff] }
 0x32f   : > { %v2064_v62 = vpop.eup %2063  ;;  %v1114_v63 = vpop.f32.mrf.mxu0 }
 0x330   : > { %1403 = vst [vmem:[%s2705_s15 + $0x30] sm:$0xff] %v1371_v60  ;;  %v1340_v2 = vmul.f32 %v2064_v62, %v1244_v58  ;;  %v1291_v4 = vmul.f32 1.442695, %v1113_v61  ;;  %v1115_v38 = vadd.f32 %v1114_v63, %v2697_v56 }
 0x331   : > { %v1118_v6 = vpop.f32.mrf.mxu0 }
 0x332   : > { %v1372_v7 = vadd.f32 %v1340_v2, %v1091_v1  ;;  %2071 = vpow2.f32 %v1291_v4  ;;  %v1119_v8 = vadd.f32 %v1118_v6, %v2691_v41  ;;  %v1252_v6 = vld [vmem:[%s2536_s16 + $0x78] sm:$0xff] }
 0x333   : > { %v2066_v9 = vpop.eup %2065  ;;  %v1120_v10 = vpop.f32.mrf.mxu0 }
 0x334   : > { %1404 = vst [vmem:[%s2705_s15 + $0x38] sm:$0xff] %v1372_v7  ;;  %v1341_v12 = vmul.f32 %v2066_v9, %v1245_v5  ;;  %v1293_v14 = vmul.f32 1.442695, %v1119_v8  ;;  %v1121_v13 = vadd.f32 %v1120_v10, %v2697_v56 }
 0x335   : > { %v1124_v16 = vpop.f32.mrf.mxu0 }
 0x336   : > { %v1373_v17 = vadd.f32 %v1341_v12, %v1097_v11  ;;  %2073 = vpow2.f32 %v1293_v14  ;;  %v1125_v18 = vadd.f32 %v1124_v16, %v2691_v41  ;;  %v1253_v16 = vld [vmem:[%s2536_s16 + $0x80] sm:$0xff] }
 0x337   : > { %v2068_v19 = vpop.eup %2067  ;;  %v1126_v20 = vpop.f32.mrf.mxu0 }
 0x338   : > { %1405 = vst [vmem:[%s2705_s15 + $0x40] sm:$0xff] %v1373_v17  ;;  %v1342_v22 = vmul.f32 %v2068_v19, %v1246_v15  ;;  %v1295_v23 = vmul.f32 1.442695, %v1125_v18  ;;  %v1127_v55 = vadd.f32 %v1126_v20, %v2697_v56 }
 0x339   : > { %v1130_v25 = vpop.f32.mrf.mxu0 }
 0x33a   : > { %v1374_v26 = vadd.f32 %v1342_v22, %v1103_v21  ;;  %2075 = vpow2.f32 %v1295_v23  ;;  %v1131_v27 = vadd.f32 %v1130_v25, %v2691_v41  ;;  %v1254_v25 = vld [vmem:[%s2536_s16 + $0x88] sm:$0xff] }
 0x33b   : > { %v2070_v28 = vpop.eup %2069  ;;  %v1132_v29 = vpop.f32.mrf.mxu0 }
 0x33c   : > { %1406 = vst [vmem:[%s2705_s15 + $0x48] sm:$0xff] %v1374_v26  ;;  %v1343_v31 = vmul.f32 %v2070_v28, %v1247_v24  ;;  %v1297_v32 = vmul.f32 1.442695, %v1131_v27  ;;  %v1133_v2 = vadd.f32 %v1132_v29, %v2697_v56 }
 0x33d   : > { %v1136_v34 = vpop.f32.mrf.mxu0 }
 0x33e   : > { %v1375_v35 = vadd.f32 %v1343_v31, %v1109_v30  ;;  %2077 = vpow2.f32 %v1297_v32  ;;  %v1137_v36 = vadd.f32 %v1136_v34, %v2691_v41  ;;  %v1255_v34 = vld [vmem:[%s2536_s16 + $0x90] sm:$0xff] }
 0x33f   : > { %v2072_v37 = vpop.eup %2071  ;;  %v1138_v3 = vpop.f32.mrf.mxu0 }
 0x340   : > { %1407 = vst [vmem:[%s2705_s15 + $0x50] sm:$0xff] %v1375_v35  ;;  %v1344_v39 = vmul.f32 %v2072_v37, %v1248_v33  ;;  %v1299_v40 = vmul.f32 1.442695, %v1137_v36  ;;  %v1139_v12 = vadd.f32 %v1138_v3, %v2697_v56 }
 0x341   : > { %v1142_v43 = vpop.f32.mrf.mxu0 }
 0x342   : > { %v1376_v44 = vadd.f32 %v1344_v39, %v1115_v38  ;;  %2079 = vpow2.f32 %v1299_v40  ;;  %v1143_v45 = vadd.f32 %v1142_v43, %v2691_v41  ;;  %v1256_v43 = vld [vmem:[%s2536_s16 + $0x98] sm:$0xff] }
 0x343   : > { %v2074_v46 = vpop.eup %2073  ;;  %v1144_v0 = vpop.f32.mrf.mxu0 }
 0x344   : > { %1408 = vst [vmem:[%s2705_s15 + $0x58] sm:$0xff] %v1376_v44  ;;  %v1345_v47 = vmul.f32 %v2074_v46, %v1249_v42  ;;  %v1301_v48 = vmul.f32 1.442695, %v1143_v45  ;;  %v1145_v22 = vadd.f32 %v1144_v0, %v2697_v56 }
 0x345   : > { %v1148_v50 = vpop.f32.mrf.mxu0 }
 0x346   : > { %v1377_v51 = vadd.f32 %v1345_v47, %v1121_v13  ;;  %2081 = vpow2.f32 %v1301_v48  ;;  %v1149_v52 = vadd.f32 %v1148_v50, %v2691_v41  ;;  %v1257_v50 = vld [vmem:[%s2536_s16 + $0xa0] sm:$0xff] }
 0x347   : > { %v2076_v53 = vpop.eup %2075  ;;  %v1150_v54 = vpop.f32.mrf.mxu0 }
 0x348   : > { %1409 = vst [vmem:[%s2705_s15 + $0x60] sm:$0xff] %v1377_v51  ;;  %v1346_v57 = vmul.f32 %v2076_v53, %v1250_v49  ;;  %v1303_v58 = vmul.f32 1.442695, %v1149_v52  ;;  %v1151_v31 = vadd.f32 %v1150_v54, %v2697_v56 }
 0x349   : > { %v1154_v60 = vpop.f32.mrf.mxu0 }
 0x34a   : > { %v1378_v61 = vadd.f32 %v1346_v57, %v1127_v55  ;;  %2083 = vpow2.f32 %v1303_v58  ;;  %v1155_v62 = vadd.f32 %v1154_v60, %v2691_v41  ;;  %v1258_v60 = vld [vmem:[%s2536_s16 + $0xa8] sm:$0xff] }
 0x34b   : > { %v2078_v63 = vpop.eup %2077  ;;  %v1156_v1 = vpop.f32.mrf.mxu0 }
 0x34c   : > { %1410 = vst [vmem:[%s2705_s15 + $0x68] sm:$0xff] %v1378_v61  ;;  %v1347_v4 = vmul.f32 %v2078_v63, %v1251_v59  ;;  %v1305_v5 = vmul.f32 1.442695, %v1155_v62  ;;  %v1157_v39 = vadd.f32 %v1156_v1, %v2697_v56 }
 0x34d   : > { %v1160_v7 = vpop.f32.mrf.mxu0 }
 0x34e   : > { %v1379_v8 = vadd.f32 %v1347_v4, %v1133_v2  ;;  %2085 = vpow2.f32 %v1305_v5  ;;  %v1161_v9 = vadd.f32 %v1160_v7, %v2691_v41  ;;  %v1259_v7 = vld [vmem:[%s2536_s16 + $0xb0] sm:$0xff] }
 0x34f   : > { %v2080_v10 = vpop.eup %2079  ;;  %v1162_v11 = vpop.f32.mrf.mxu0 }
 0x350   : > { %1411 = vst [vmem:[%s2705_s15 + $0x70] sm:$0xff] %v1379_v8  ;;  %v1348_v14 = vmul.f32 %v2080_v10, %v1252_v6  ;;  %v1307_v15 = vmul.f32 1.442695, %v1161_v9  ;;  %v1163_v47 = vadd.f32 %v1162_v11, %v2697_v56 }
 0x351   : > { %v1166_v17 = vpop.f32.mrf.mxu0 }
 0x352   : > { %v1380_v18 = vadd.f32 %v1348_v14, %v1139_v12  ;;  %2087 = vpow2.f32 %v1307_v15  ;;  %v1167_v19 = vadd.f32 %v1166_v17, %v2691_v41  ;;  %v1260_v17 = vld [vmem:[%s2536_s16 + $0xb8] sm:$0xff] }
 0x353   : > { %v2082_v20 = vpop.eup %2081  ;;  %v1168_v21 = vpop.f32.mrf.mxu0 }
 0x354   : > { %1412 = vst [vmem:[%s2705_s15 + $0x78] sm:$0xff] %v1380_v18  ;;  %v1349_v23 = vmul.f32 %v2082_v20, %v1253_v16  ;;  %v1309_v24 = vmul.f32 1.442695, %v1167_v19  ;;  %v1169_v57 = vadd.f32 %v1168_v21, %v2697_v56 }
 0x355   : > { %v1172_v26 = vpop.f32.mrf.mxu0 }
 0x356   : > { %v1381_v27 = vadd.f32 %v1349_v23, %v1145_v22  ;;  %2089 = vpow2.f32 %v1309_v24  ;;  %v1173_v28 = vadd.f32 %v1172_v26, %v2691_v41  ;;  %v1261_v26 = vld [vmem:[%s2536_s16 + $0xc0] sm:$0xff] }
 0x357   : > { %v2084_v29 = vpop.eup %2083  ;;  %v1174_v30 = vpop.f32.mrf.mxu0 }
 0x358   : > { %1413 = vst [vmem:[%s2705_s15 + $0x80] sm:$0xff] %v1381_v27  ;;  %v1350_v32 = vmul.f32 %v2084_v29, %v1254_v25  ;;  %v1311_v33 = vmul.f32 1.442695, %v1173_v28  ;;  %v1175_v4 = vadd.f32 %v1174_v30, %v2697_v56 }
 0x359   : > { %v1178_v35 = vpop.f32.mrf.mxu0 }
 0x35a   : > { %v1382_v36 = vadd.f32 %v1350_v32, %v1151_v31  ;;  %2091 = vpow2.f32 %v1311_v33  ;;  %v1179_v37 = vadd.f32 %v1178_v35, %v2691_v41  ;;  %v1262_v35 = vld [vmem:[%s2536_s16 + $0xc8] sm:$0xff] }
 0x35b   : > { %v2086_v3 = vpop.eup %2085  ;;  %v1180_v38 = vpop.f32.mrf.mxu0 }
 0x35c   : > { %1414 = vst [vmem:[%s2705_s15 + $0x88] sm:$0xff] %v1382_v36  ;;  %v1351_v40 = vmul.f32 %v2086_v3, %v1255_v34  ;;  %v1313_v42 = vmul.f32 1.442695, %v1179_v37  ;;  %v1181_v14 = vadd.f32 %v1180_v38, %v2697_v56 }
 0x35d   : > { %v1184_v44 = vpop.f32.mrf.mxu0 }
 0x35e   : > { %v1383_v45 = vadd.f32 %v1351_v40, %v1157_v39  ;;  %2093 = vpow2.f32 %v1313_v42  ;;  %v1185_v46 = vadd.f32 %v1184_v44, %v2691_v41  ;;  %v1263_v44 = vld [vmem:[%s2536_s16 + $0xd0] sm:$0xff] }
 0x35f   : > { %v2088_v0 = vpop.eup %2087  ;;  %v1186_v13 = vpop.f32.mrf.mxu0 }
 0x360   : > { %1415 = vst [vmem:[%s2705_s15 + $0x90] sm:$0xff] %v1383_v45  ;;  %v1352_v48 = vmul.f32 %v2088_v0, %v1256_v43  ;;  %v1315_v49 = vmul.f32 1.442695, %v1185_v46  ;;  %v1187_v23 = vadd.f32 %v1186_v13, %v2697_v56 }
 0x361   : > { %v1190_v51 = vpop.f32.mrf.mxu0 }
 0x362   : > { %v1384_v52 = vadd.f32 %v1352_v48, %v1163_v47  ;;  %2095 = vpow2.f32 %v1315_v49  ;;  %v1191_v53 = vadd.f32 %v1190_v51, %v2691_v41  ;;  %v1264_v51 = vld [vmem:[%s2536_s16 + $0xd8] sm:$0xff] }
 0x363   : > { %v2090_v54 = vpop.eup %2089  ;;  %v1192_v55 = vpop.f32.mrf.mxu0 }
 0x364   : > { %1416 = vst [vmem:[%s2705_s15 + $0x98] sm:$0xff] %v1384_v52  ;;  %v1353_v58 = vmul.f32 %v2090_v54, %v1257_v50  ;;  %v1317_v59 = vmul.f32 1.442695, %v1191_v53  ;;  %v1193_v32 = vadd.f32 %v1192_v55, %v2697_v56 }
 0x365   : > { %v1196_v61 = vpop.f32.mrf.mxu0 }
 0x366   : > { %v1385_v62 = vadd.f32 %v1353_v58, %v1169_v57  ;;  %2097 = vpow2.f32 %v1317_v59  ;;  %v1197_v63 = vadd.f32 %v1196_v61, %v2691_v41 }
 0x367   : > { %v2092_v1 = vpop.eup %2091  ;;  %v1198_v2 = vpop.f32.mrf.mxu0 }
 0x368   : > { %1417 = vst [vmem:[%s2705_s15 + $0xa0] sm:$0xff] %v1385_v62  ;;  %v1354_v5 = vmul.f32 %v2092_v1, %v1258_v60  ;;  %v1319_v6 = vmul.f32 1.442695, %v1197_v63  ;;  %v1199_v40 = vadd.f32 %v1198_v2, %v2697_v56  ;;  %v1265_v60 = vld [vmem:[%s2536_s16 + $0xe0] sm:$0xff] }
 0x369   : > { %v1202_v8 = vpop.f32.mrf.mxu0 }
 0x36a   : > { %v1386_v9 = vadd.f32 %v1354_v5, %v1175_v4  ;;  %2099 = vpow2.f32 %v1319_v6  ;;  %v1203_v10 = vadd.f32 %v1202_v8, %v2691_v41 }
 0x36b   : > { %v2094_v11 = vpop.eup %2093  ;;  %v1204_v12 = vpop.f32.mrf.mxu0 }
 0x36c   : > { %1418 = vst [vmem:[%s2705_s15 + $0xa8] sm:$0xff] %v1386_v9  ;;  %v1355_v15 = vmul.f32 %v2094_v11, %v1259_v7  ;;  %v1321_v16 = vmul.f32 1.442695, %v1203_v10  ;;  %v1205_v48 = vadd.f32 %v1204_v12, %v2697_v56  ;;  %v1267_v7 = vld [vmem:[%s2536_s16 + $0xf0] sm:$0xff] }
 0x36d   : > { %v1208_v18 = vpop.f32.mrf.mxu0 }
 0x36e   : > { %v1387_v19 = vadd.f32 %v1355_v15, %v1181_v14  ;;  %2101 = vpow2.f32 %v1321_v16  ;;  %v1209_v20 = vadd.f32 %v1208_v18, %v2691_v41  ;;  %v1268_v14 = vld [vmem:[%s2536_s16 + $0xf8] sm:$0xff] }
 0x36f   : > { %v2096_v21 = vpop.eup %2095  ;;  %v1210_v22 = vpop.f32.mrf.mxu0 }
 0x370   : > { %1419 = vst [vmem:[%s2705_s15 + $0xb0] sm:$0xff] %v1387_v19  ;;  %v1356_v24 = vmul.f32 %v2096_v21, %v1260_v17  ;;  %v1323_v25 = vmul.f32 1.442695, %v1209_v20  ;;  %v1211_v57 = vadd.f32 %v1210_v22, %v2697_v56 }
 0x371   : > { %v1214_v27 = vpop.f32.mrf.mxu0 }
 0x372   : > { %v1388_v28 = vadd.f32 %v1356_v24, %v1187_v23  ;;  %2103 = vpow2.f32 %v1323_v25  ;;  %v1215_v29 = vadd.f32 %v1214_v27, %v2691_v41 }
 0x373   : > { %v2098_v30 = vpop.eup %2097  ;;  %v1216_v31 = vpop.f32.mrf.mxu0 }
 0x374   : > { %1420 = vst [vmem:[%s2705_s15 + $0xb8] sm:$0xff] %v1388_v28  ;;  %v1357_v33 = vmul.f32 %v2098_v30, %v1261_v26  ;;  %v1325_v34 = vmul.f32 1.442695, %v1215_v29  ;;  %v1217_v63 = vadd.f32 %v1216_v31, %v2697_v56 }
 0x375   : > { %v1220_v36 = vpop.f32.mrf.mxu0 }
 0x376   : > { %v1389_v37 = vadd.f32 %v1357_v33, %v1193_v32  ;;  %2105 = vpow2.f32 %v1325_v34  ;;  %v1221_v3 = vadd.f32 %v1220_v36, %v2691_v41 }
 0x377   : > { %v2100_v38 = vpop.eup %2099  ;;  %v1222_v39 = vpop.f32.mrf.mxu0 }
 0x378   : > { %1421 = vst [vmem:[%s2705_s15 + $0xc0] sm:$0xff] %v1389_v37  ;;  %v1358_v42 = vmul.f32 %v2100_v38, %v1262_v35  ;;  %v1327_v43 = vmul.f32 1.442695, %v1221_v3  ;;  %v1223_v5 = vadd.f32 %v1222_v39, %v2697_v56 }
 0x379   : > { %v1226_v45 = vpop.f32.mrf.mxu0 }
 0x37a   : > { %v1390_v46 = vadd.f32 %v1358_v42, %v1199_v40  ;;  %2107 = vpow2.f32 %v1327_v43  ;;  %v1227_v0 = vadd.f32 %v1226_v45, %v2691_v41 }
 0x37b   : > { %v2102_v13 = vpop.eup %2101  ;;  %v1228_v47 = vpop.f32.mrf.mxu0 }
 0x37c   : > { %1422 = vst [vmem:[%s2705_s15 + $0xc8] sm:$0xff] %v1390_v46  ;;  %v1359_v49 = vmul.f32 %v2102_v13, %v1263_v44  ;;  %v1329_v50 = vmul.f32 1.442695, %v1227_v0  ;;  %v1229_v10 = vadd.f32 %v1228_v47, %v2697_v56 }
 0x37d   : > { %v1232_v52 = vpop.f32.mrf.mxu0 }
 0x37e   : > { %v1391_v53 = vadd.f32 %v1359_v49, %v1205_v48  ;;  %2109 = vpow2.f32 %v1329_v50  ;;  %v1233_v54 = vadd.f32 %v1232_v52, %v2691_v41  ;;  %v1266_v41 = vld [vmem:[%s2536_s16 + $0xe8] sm:$0xff] }
 0x37f   : > { %v2104_v55 = vpop.eup %2103  ;;  %v1234_v12 = vpop.f32.mrf.mxu0 }
 0x380   : > { %1423 = vst [vmem:[%s2705_s15 + $0xd0] sm:$0xff] %v1391_v53  ;;  %v1360_v58 = vmul.f32 %v2104_v55, %v1264_v51  ;;  %v1331_v59 = vmul.f32 1.442695, %v1233_v54  ;;  %v1235_v17 = vadd.f32 %v1234_v12, %v2697_v56 }
 0x382   : > { %v1392_v61 = vadd.f32 %v1360_v58, %v1211_v57  ;;  %2111 = vpow2.f32 %v1331_v59 }
 0x383   : > { %v2106_v62 = vpop.eup %2105 }
 0x384   : > { %1424 = vst [vmem:[%s2705_s15 + $0xd8] sm:$0xff] %v1392_v61  ;;  %v1361_v1 = vmul.f32 %v2106_v62, %v1265_v60 }
 0x386   : > { %v1393_v2 = vadd.f32 %v1361_v1, %v1217_v63 }
 0x387   : > { %v2108_v4 = vpop.eup %2107 }
 0x388   : > { %1425 = vst [vmem:[%s2705_s15 + $0xe0] sm:$0xff] %v1393_v2  ;;  %v1362_v6 = vmul.f32 %v2108_v4, %v1266_v41 }
 0x38a   : > { %v1394_v8 = vadd.f32 %v1362_v6, %v1223_v5 }
 0x38b   : > { %v2110_v9 = vpop.eup %2109 }
 0x38c   : > { %1426 = vst [vmem:[%s2705_s15 + $0xe8] sm:$0xff] %v1394_v8  ;;  %v1363_v11 = vmul.f32 %v2110_v9, %v1267_v7 }
 0x38e   : > { %v1395_v15 = vadd.f32 %v1363_v11, %v1229_v10 }
 0x38f   : > { %v2112_v16 = vpop.eup %2111 }
 0x390   : > { %1427 = vst [vmem:[%s2705_s15 + $0xf0] sm:$0xff] %v1395_v15  ;;  %v1364_v18 = vmul.f32 %v2112_v16, %v1268_v14 }
 0x392   : > { %v1396_v19 = vadd.f32 %v1364_v18, %v1235_v17 }
 0x394   : > { %1428 = vst [vmem:[%s2705_s15 + $0xf8] sm:$0xff] %v1396_v19 }
 0x395   : > { %2234 = shalt.err (!%p2231_p4)
}
 0x396   : > { %s2235_s16 = scalar_lea.hbm %s2830_s10, 4096  ;;  %s2239_s18 = scalar_lea.hbm %s2882_s6, 8192 }
 0x397   : > { %p2236_p10 = scmp.ne.s32.totalorder %s2830_s10, %s2235_s16  ;;  %p2240_p2 = scmp.lt.s32.totalorder %s2830_s10, %s2882_s6 }
 0x398   : > { %p2241_p6 = scmp.lt.s32.totalorder %s2239_s18, %s2235_s16 }
 0x399   : > { %p2237_p7 = pnand %p2236_p10, %p2909_p5 }
 0x39a   : > { %p2242_p12 = por %p2241_p6, %p2240_p2 }
 0x39b   : > { %p2238_p8 = pneg %p2237_p7 }
 0x39d   : > { %p2243_p0 = pnand %p2242_p12, %p2238_p8 }
 0x39f   : > { %2246 = shalt.err (!%p2243_p0)
}
 0x3a0   : > { %s2309_s14 = smov 128   ;;  %s2310_s15 = smov 8  }
 0x3a1   : > { %1854 = dma.vmem_to_hbm [thread:$0]  (%p2909_p5), %s2832_s17, 4096, %s2830_s10, %s1430_s8, %s2309_s14, %s2309_s14, %s2310_s15  }
 0x3a2 PF: > { %s1458_s13 = sand.u32 1, %s2285_s21   ;;  %p2910_p3 = scmp.ne.s32.totalorder %s2894_s28, 0 }
 0x3a3   : > { %p2911_p11 = scmp.ge.s32.totalorder %s2297_s24, 2  ;;  %s1459_s19 = scalar_lea.sflag [#allocation4], %s1458_s13 }
 0x3a5   : > { %p1871_p9 = pnand %p2911_p11, %p2910_p3 }
 0x3a7   : > { %p1872_p13 = pneg %p1871_p9 }
 0x3a9   : > { %2280 = dma.done.wait (%p1872_p13), %s1459_s19, 4096  }
 0x3aa   : > { %2282 = vsyncadd (%p1872_p13), %s1459_s19, 4294963200  ;;  %p23_p1 = scmp.ge.s32.totalorder %s2421_s26, 4   ;;  %s2912_s21 = smov %s2289_s22 }
 0x3ab   : > { %s2913_s22 = smov %s2293_s23  ;;  %s2914_s23 = smov %s2430_s9 }
 0x3ac   : > { %s2915_s24 = smov %s2421_s26  ;;  %25 = sbr.rel (!%p23_p1) target bundleno = 12 (0xc), region = 112 }
 0x3b1   :  { %1464 = vsyncpa [#allocation3], 1 }
 0x3b2   :  { %1466 = vsyncpa [#allocation3 + $0x1], 1 }
 0x3b3   :  { %1467 = vsyncpa [#allocation6], 1 }
 0x3b4   :  { %1469 = vsyncpa [#allocation6 + $0x1], 1 }
 0x3b5   :  { %1470 = vsyncpa [#allocation9], 1 }
 0x3b6   :  { %1471 = vsyncpa [#allocation4], 1 }
 0x3b7   :  { %1473 = vsyncpa [#allocation4 + $0x1], 1 }

</bundles_post_ra>
